<compile_context>
chip_gen: v6e
topology: v6e:2x2x1
jax: 0.10.0
libtpu: 0.0.40
codegen_flags: <defaults>
</compile_context>

<pallas_src>
import functools
import numpy as np
import jax
import jax.numpy as jnp
from jax.experimental import pallas as pl
from jax.experimental.pallas import tpu as pltpu

VMEM_LIMIT = 48 * 1024 * 1024        # fits v7x (64 MiB) scoped budget too
DIRECT_CONV_VMEM_BUDGET = 24 * 1024 * 1024
BN_EPS_ENC = 1e-3                    # torchvision efficientnet_b5 BN eps
BN_EPS_DEC = 1e-5                    # decoder nn.BatchNorm2d default


def _round_up(x, m):
    return (x + m - 1) // m * m


def _apply_act(y, act):
    if act == "id":
        return y
    if act == "relu":
        return jnp.maximum(y, 0.0)
    if act == "silu":
        return y * jax.nn.sigmoid(y)
    if act == "sigmoid":
        return jax.nn.sigmoid(y)
    if act == "gelu":  # exact erf GELU == nn.GELU() default
        return 0.5 * y * (1.0 + jax.lax.erf(y * np.float32(1.0 / np.sqrt(2.0))))
    raise ValueError(act)


# ----------------------------------------------------------------------------
# Fused matmul conv:  out = act(A@B * scale + bias [+ residual])
# Single K step + full-Cout N tile -> grid only over M; the activation (A) is
# read from HBM once, the small weight block once; no scratch accumulator.
# ----------------------------------------------------------------------------
def _matmul_fused_kernel(*refs, act, has_res):
    if has_res:
        a_ref, b_ref, s_ref, c_ref, r_ref, o_ref = refs
    else:
        a_ref, b_ref, s_ref, c_ref, o_ref = refs
        r_ref = None
    y = jnp.dot(a_ref[...], b_ref[...], preferred_element_type=jnp.float32)
    y = y * s_ref[...] + c_ref[...]
    if r_ref is not None:
        y = y + r_ref[...].astype(jnp.float32)
    o_ref[...] = _apply_act(y, act).astype(o_ref.dtype)


@functools.lru_cache(maxsize=None)
def _mm_conv_builder(x_shape, w_shape, stride, pad, act, has_res, out_dtype_name):
    N, H, W, Cin = x_shape
    kh, kw, _, Cout = w_shape
    Ho = (H + 2 * pad - kh) // stride + 1
    Wo = (W + 2 * pad - kw) // stride + 1
    M = N * Ho * Wo
    K = kh * kw * Cin
    tm = min(512, _round_up(M, 8))
    Mp = _round_up(M, tm)
    Kp = _round_up(K, 8)     # channels already x8 -> no extra activation copy
    Np = _round_up(Cout, 8)  # TODO(synk): persistent 128-lane padding across layers
    out_dtype = jnp.dtype(out_dtype_name)

    in_specs = [pl.BlockSpec((tm, Kp), lambda i: (i, 0)),
                pl.BlockSpec((Kp, Np), lambda i: (0, 0)),
                pl.BlockSpec((1, Np), lambda i: (0, 0)),
                pl.BlockSpec((1, Np), lambda i: (0, 0))]
    if has_res:
        in_specs.append(pl.BlockSpec((tm, Np), lambda i: (i, 0)))

    call = pl.pallas_call(
        functools.partial(_matmul_fused_kernel, act=act, has_res=has_res),
        out_shape=jax.ShapeDtypeStruct((Mp, Np), out_dtype),
        grid_spec=pltpu.PrefetchScalarGridSpec(
            num_scalar_prefetch=0,
            grid=(Mp // tm,),
            in_specs=in_specs,
            out_specs=pl.BlockSpec((tm, Np), lambda i: (i, 0))),
        compiler_params=pltpu.CompilerParams(
            dimension_semantics=("parallel",),
            vmem_limit_bytes=VMEM_LIMIT),
    )

    def run(x, w, scale, bias, residual=None):
        xb = x.astype(jnp.bfloat16)
        if kh == 1 and kw == 1 and stride == 1 and pad == 0:
            cols = xb.reshape(M, Cin)
        else:
            xp = jnp.pad(xb, ((0, 0), (pad, pad), (pad, pad), (0, 0)))
            patches = [xp[:, i:i + stride * Ho:stride, j:j + stride * Wo:stride, :]
                       for i in range(kh) for j in range(kw)]
            cols = jnp.concatenate(patches, axis=-1).reshape(M, K)
        if Mp != M or Kp != K:
            cols = jnp.pad(cols, ((0, Mp - M), (0, Kp - K)))
        wmat = w.reshape(K, Cout).astype(jnp.bfloat16)
        if Kp != K or Np != Cout:
            wmat = jnp.pad(wmat, ((0, Kp - K), (0, Np - Cout)))
        s = scale.reshape(1, Cout).astype(jnp.float32)
        c = bias.reshape(1, Cout).astype(jnp.float32)
        if Np != Cout:
            s = jnp.pad(s, ((0, 0), (0, Np - Cout)))
            c = jnp.pad(c, ((0, 0), (0, Np - Cout)))
        args = [cols, wmat, s, c]
        if has_res:
            r = residual.reshape(M, Cout).astype(jnp.bfloat16)
            if Mp != M or Np != Cout:
                r = jnp.pad(r, ((0, Mp - M), (0, Np - Cout)))
            args.append(r)
        out = call(*args)
        if Mp != M or Np != Cout:
            out = out[:M, :Cout]
        return out.reshape(N, Ho, Wo, Cout)

    return jax.jit(run)


# ----------------------------------------------------------------------------
# Direct kxk stride-1 "same" conv (decoder 3x3s): grid over batch, full padded
# image resident in VMEM, k*k shifted-window matmuls accumulated in-kernel.
# Removes the materialized im2col (k^2 HBM inflation).
# ----------------------------------------------------------------------------
@functools.lru_cache(maxsize=None)
def _direct_conv_builder(x_shape, w_shape, act, out_dtype_name):
    N, H, W, Cin = x_shape
    kh, kw, _, Cout = w_shape
    pad = (kh - 1) // 2
    Hp, Wp = H + 2 * pad, W + 2 * pad
    Ho, Wo = H, W
    HWo = Ho * Wo
    out_dtype = jnp.dtype(out_dtype_name)

    def kernel(x_ref, w_ref, s_ref, c_ref, o_ref):
        acc = jnp.zeros((HWo, Cout), jnp.float32)
        for i in range(kh):              # unrolled tap loop (static slices)
            for j in range(kw):
                slab = x_ref[0, i:i + Ho, j:j + Wo, :]
                acc = acc + jnp.dot(slab.reshape(HWo, Cin), w_ref[i, j],
                                    preferred_element_type=jnp.float32)
        y = acc * s_ref[...] + c_ref[...]
        o_ref[0] = _apply_act(y, act).astype(o_ref.dtype)

    call = pl.pallas_call(
        kernel,
        out_shape=jax.ShapeDtypeStruct((N, HWo, Cout), out_dtype),
        grid_spec=pltpu.PrefetchScalarGridSpec(
            num_scalar_prefetch=0,
            grid=(N,),
            in_specs=[pl.BlockSpec((1, Hp, Wp, Cin), lambda n: (n, 0, 0, 0)),
                      pl.BlockSpec((kh, kw, Cin, Cout), lambda n: (0, 0, 0, 0)),
                      pl.BlockSpec((1, Cout), lambda n: (0, 0)),
                      pl.BlockSpec((1, Cout), lambda n: (0, 0))],
            out_specs=pl.BlockSpec((1, HWo, Cout), lambda n: (n, 0, 0))),
        compiler_params=pltpu.CompilerParams(
            dimension_semantics=("parallel",),
            vmem_limit_bytes=VMEM_LIMIT),
    )

    def run(x, w, scale, bias):
        xp = jnp.pad(x.astype(jnp.bfloat16),
                     ((0, 0), (pad, pad), (pad, pad), (0, 0)))
        out = call(xp, w.astype(jnp.bfloat16),
                   scale.reshape(1, Cout).astype(jnp.float32),
                   bias.reshape(1, Cout).astype(jnp.float32))
        return out.reshape(N, Ho, Wo, Cout)

    return jax.jit(run)


def conv_bn_act(x, w, scale, bias, *, stride=1, pad=0, act="id",
                residual=None, out_dtype=jnp.bfloat16):
    x_shape = tuple(int(d) for d in x.shape)
    w_shape = tuple(int(d) for d in w.shape)
    N, H, W, Cin = x_shape
    kh, kw, _, Cout = w_shape
    direct_ok = (kh > 1 and kh == kw and stride == 1 and pad == (kh - 1) // 2
                 and residual is None and H % 8 == 0 and W % 8 == 0)
    if direct_ok:
        halo = (H + 2 * pad) * (W + 2 * pad) * Cin * 2
        est = 2 * halo + H * W * Cout * 4 + 2 * H * W * Cout * 2 \
            + kh * kw * Cin * Cout * 2
        direct_ok = est < DIRECT_CONV_VMEM_BUDGET
    if direct_ok:
        fn = _direct_conv_builder(x_shape, w_shape, act,
                                  jnp.dtype(out_dtype).name)
        return fn(x, w, scale, bias)
    fn = _mm_conv_builder(x_shape, w_shape, int(stride), int(pad), act,
                          residual is not None, jnp.dtype(out_dtype).name)
    if residual is not None:
        return fn(x, w, scale, bias, residual)
    return fn(x, w, scale, bias)


# ----------------------------------------------------------------------------
# Depthwise conv: grid over batch, padded image (stride 1) or its 2x2 phase
# split (stride 2) resident in VMEM, unrolled in-kernel tap loop + BN + act.
# ----------------------------------------------------------------------------
@functools.lru_cache(maxsize=None)
def _dw_builder(x_shape, ksize, stride, act):
    N, H, W, C = x_shape
    k, s = ksize, stride
    pad = (k - 1) // 2
    Hp, Wp = H + 2 * pad, W + 2 * pad
    Ho = (Hp - k) // s + 1
    Wo = (Wp - k) // s + 1
    if s == 1:
        Hh, Wh = Hp, Wp
    else:
        assert s == 2 and Hp % 2 == 0 and Wp % 2 == 0
        Hh, Wh = Hp // 2, Wp // 2

    def kernel(x_ref, w_ref, sc_ref, b_ref, o_ref):
        acc = jnp.zeros((Ho, Wo, C), jnp.float32)
        for i in range(k):               # unrolled tap loop (static slices)
            for j in range(k):
                ph = (i % s) * s + (j % s)
                oi, oj = i // s, j // s
                slab = x_ref[0, ph, oi:oi + Ho, oj:oj + Wo, :].astype(jnp.float32)
                acc = acc + slab * w_ref[i, j:j + 1, :]
        y = acc * sc_ref[...] + b_ref[...]
        o_ref[0] = _apply_act(y, act).astype(o_ref.dtype)

    call = pl.pallas_call(
        kernel,
        out_shape=jax.ShapeDtypeStruct((N, Ho, Wo, C), jnp.bfloat16),
        grid_spec=pltpu.PrefetchScalarGridSpec(
            num_scalar_prefetch=0,
            grid=(N,),
            in_specs=[pl.BlockSpec((1, s * s, Hh, Wh, C),
                                   lambda n: (n, 0, 0, 0, 0)),
                      pl.BlockSpec((k, k, C), lambda n: (0, 0, 0)),
                      pl.BlockSpec((1, C), lambda n: (0, 0)),
                      pl.BlockSpec((1, C), lambda n: (0, 0))],
            out_specs=pl.BlockSpec((1, Ho, Wo, C), lambda n: (n, 0, 0, 0))),
        compiler_params=pltpu.CompilerParams(
            dimension_semantics=("parallel",),
            vmem_limit_bytes=VMEM_LIMIT),
    )

    def run(x, w, scale, bias):
        xb = x.astype(jnp.bfloat16)
        xp = jnp.pad(xb, ((0, 0), (pad, pad), (pad, pad), (0, 0)))
        if s == 1:
            xph = xp[:, None]                                 # (N,1,Hp,Wp,C)
        else:
            phases = [xp[:, pi::2, pj::2, :]
                      for pi in range(2) for pj in range(2)]  # space-to-depth
            xph = jnp.stack(phases, axis=1)                   # (N,4,Hh,Wh,C)
        return call(xph, w.astype(jnp.float32),
                    scale.reshape(1, C).astype(jnp.float32),
                    bias.reshape(1, C).astype(jnp.float32))

    return jax.jit(run)


def depthwise_conv_bn_act(x, w, scale, bias, *, stride, act="silu"):
    fn = _dw_builder(tuple(int(d) for d in x.shape), int(w.shape[0]),
                     int(stride), act)
    return fn(x, w, scale, bias)


# ----------------------------------------------------------------------------
# Fused squeeze-excitation: GAP -> fc1 -> SiLU -> fc2 -> sigmoid -> rescale
# ----------------------------------------------------------------------------
def _se_kernel(x_ref, w1_ref, b1_ref, w2_ref, b2_ref, o_ref):
    x = x_ref[0].astype(jnp.float32)                       # [HW, C]
    pooled = jnp.mean(x, axis=0, keepdims=True)            # [1, C]
    p8 = jnp.broadcast_to(pooled, (8, pooled.shape[1]))    # sublane-friendly M
    h = jnp.dot(p8, w1_ref[...], preferred_element_type=jnp.float32) + b1_ref[...]
    h = h * jax.nn.sigmoid(h)                              # SiLU
    s = jnp.dot(h, w2_ref[...], preferred_element_type=jnp.float32) + b2_ref[...]
    s = jax.nn.sigmoid(s[0:1, :])                          # [1, C]
    o_ref[0] = (x * s).astype(o_ref.dtype)


@functools.lru_cache(maxsize=None)
def _se_builder(x_shape, sq):
    N, H, W, C = x_shape
    HW = H * W
    call = pl.pallas_call(
        _se_kernel,
        out_shape=jax.ShapeDtypeStruct((N, HW, C), jnp.bfloat16),
        grid_spec=pltpu.PrefetchScalarGridSpec(
            num_scalar_prefetch=0,
            grid=(N,),
            in_specs=[pl.BlockSpec((1, HW, C), lambda n: (n, 0, 0)),
                      pl.BlockSpec((C, sq), lambda n: (0, 0)),
                      pl.BlockSpec((1, sq), lambda n: (0, 0)),
                      pl.BlockSpec((sq, C), lambda n: (0, 0)),
                      pl.BlockSpec((1, C), lambda n: (0, 0))],
            out_specs=pl.BlockSpec((1, HW, C), lambda n: (n, 0, 0))),
        compiler_params=pltpu.CompilerParams(
            dimension_semantics=("parallel",),
            vmem_limit_bytes=VMEM_LIMIT),
    )

    def run(x, w1, b1, w2, b2):
        x3 = x.astype(jnp.bfloat16).reshape(N, HW, C)
        out = call(x3, w1, b1, w2, b2)
        return out.reshape(N, H, W, C)

    return jax.jit(run)


def se_apply(x, w1, b1, w2, b2):
    fn = _se_builder(tuple(int(d) for d in x.shape), int(w1.shape[1]))
    return fn(x, w1, b1, w2, b2)


# ----------------------------------------------------------------------------
# Layout glue
# ----------------------------------------------------------------------------
def upsample_nearest2x(x):
    N, H, W, C = x.shape
    x = jnp.broadcast_to(x[:, :, None, :, None, :], (N, H, 2, W, 2, C))
    return x.reshape(N, H * 2, W * 2, C)


# ----------------------------------------------------------------------------
# Deterministic synthetic parameters (EfficientNet-B5 + UNet decoder)
# ----------------------------------------------------------------------------
# (expand_ratio, kernel, stride, in_ch, out_ch, num_blocks)  -- B5 scaling
EFFNET_B5_CFG = [
    (1, 3, 1, 48, 24, 3),
    (6, 3, 2, 24, 40, 5),
    (6, 5, 2, 40, 64, 5),
    (6, 3, 2, 64, 128, 7),
    (6, 5, 1, 128, 176, 7),
    (6, 5, 2, 176, 304, 9),
    (6, 3, 1, 304, 512, 3),
]
STEM_CH = 48
DECODER_CFG = [(512, 176, 256), (256, 64, 128), (128, 40, 64),
               (64, 24, 64), (64, 0, 32)]


class KeyGen:
    def __init__(self, seed):
        self.key = jax.random.PRNGKey(seed)
        self.i = 0

    def __call__(self):
        self.i += 1
        return jax.random.fold_in(self.key, self.i)


def init_conv(kg, kh, kw, cin, cout):
    fan_in = kh * kw * cin
    w = jax.random.normal(kg(), (kh, kw, cin, cout), jnp.float32)
    return (w * np.sqrt(2.0 / fan_in)).astype(jnp.bfloat16)


def init_dw(kg, k, c):
    w = jax.random.normal(kg(), (k, k, c), jnp.float32)
    return (w * np.sqrt(2.0 / (k * k))).astype(jnp.float32)


def init_bn(c, eps):
    # eval-mode BN folded: gamma=1, beta=0, running_mean=0, running_var=1
    return {"scale": jnp.full((c,), 1.0 / np.sqrt(1.0 + eps), jnp.float32),
            "bias": jnp.zeros((c,), jnp.float32)}


def init_mbconv(kg, cin, cout, expand_ratio, ksize):
    exp_c = cin * expand_ratio
    p = {}
    if expand_ratio != 1:
        p["expand_w"] = init_conv(kg, 1, 1, cin, exp_c)
        p["expand_bn"] = init_bn(exp_c, BN_EPS_ENC)
    p["dw_w"] = init_dw(kg, ksize, exp_c)
    p["dw_bn"] = init_bn(exp_c, BN_EPS_ENC)
    sq = max(1, cin // 4)
    sq_p = max(8, _round_up(sq, 8))      # zero-padded squeeze dim (identical fn)
    w1 = jax.random.normal(kg(), (exp_c, sq), jnp.float32) * np.sqrt(2.0 / exp_c)
    w2 = jax.random.normal(kg(), (sq, exp_c), jnp.float32) * np.sqrt(2.0 / sq)
    p["se_w1"] = jnp.pad(w1, ((0, 0), (0, sq_p - sq)))
    p["se_b1"] = jnp.zeros((1, sq_p), jnp.float32)
    p["se_w2"] = jnp.pad(w2, ((0, sq_p - sq), (0, 0)))
    p["se_b2"] = jnp.zeros((1, exp_c), jnp.float32)
    p["proj_w"] = init_conv(kg, 1, 1, exp_c, cout)
    p["proj_bn"] = init_bn(cout, BN_EPS_ENC)
    return p


def init_params(seed=0):
    kg = KeyGen(seed)
    params = {
        "norm_scale": 1.0 / jnp.array([0.229, 0.224, 0.225], jnp.float32),
        "norm_bias": -jnp.array([0.485, 0.456, 0.406], jnp.float32)
                     / jnp.array([0.229, 0.224, 0.225], jnp.float32),
        "stem": {"w": init_conv(kg, 3, 3, 3, STEM_CH),
                 "bn": init_bn(STEM_CH, BN_EPS_ENC)},
    }
    stages = []
    for (expand, k, stride, cin0, cout, nblocks) in EFFNET_B5_CFG:
        cin = cin0
        blocks = []
        for bi in range(nblocks):
            blocks.append(init_mbconv(kg, cin, cout, expand, k))
            cin = cout
        stages.append({"stride": stride, "blocks": blocks})
    params["stages"] = stages

    decoder = []
    for in_c, skip_c, out_c in DECODER_CFG:
        decoder.append({"w1": init_conv(kg, 3, 3, in_c + skip_c, out_c),
                        "bn1": init_bn(out_c, BN_EPS_DEC),
                        "w2": init_conv(kg, 3, 3, out_c, out_c),
                        "bn2": init_bn(out_c, BN_EPS_DEC)})
    params["decoder"] = decoder

    params["head_w"] = init_conv(kg, 1, 1, 32, 1)
    params["head_scale"] = jnp.ones((1,), jnp.float32)
    params["head_b"] = jnp.zeros((1,), jnp.float32)
    return params


# ----------------------------------------------------------------------------
# Forward pass
# ----------------------------------------------------------------------------
def mbconv_fwd(p, x, stride):
    cin = int(x.shape[-1])
    cout = int(p["proj_w"].shape[-1])
    h = x
    if "expand_w" in p:
        h = conv_bn_act(h, p["expand_w"], p["expand_bn"]["scale"],
                        p["expand_bn"]["bias"], act="silu")
    h = depthwise_conv_bn_act(h, p["dw_w"], p["dw_bn"]["scale"],
                              p["dw_bn"]["bias"], stride=stride, act="silu")
    h = se_apply(h, p["se_w1"], p["se_b1"], p["se_w2"], p["se_b2"])
    res = x if (stride == 1 and cin == cout) else None   # stochastic depth = id (eval)
    return conv_bn_act(h, p["proj_w"], p["proj_bn"]["scale"],
                       p["proj_bn"]["bias"], act="id", residual=res)


def decoder_block_fwd(p, x, skip):
    x = upsample_nearest2x(x)                 # nn.Upsample(scale_factor=2), nearest
    if skip is not None:
        x = jnp.concatenate([x, skip.astype(x.dtype)], axis=-1)
    x = conv_bn_act(x, p["w1"], p["bn1"]["scale"], p["bn1"]["bias"],
                    pad=1, act="gelu")
    x = conv_bn_act(x, p["w2"], p["bn2"]["scale"], p["bn2"]["bias"],
                    pad=1, act="gelu")
    return x


def efficient_unet_forward(params, x_nchw):
    x = jnp.transpose(x_nchw, (0, 2, 3, 1)).astype(jnp.float32)   # -> NHWC
    # torchvision Normalize(mean, std): folded into the stem conv's XLA producer
    # chain (no standalone lane-sparse affine kernel / HBM round trip).
    x = x * params["norm_scale"] + params["norm_bias"]

    # stem: Conv 3x3 /2 + BN + SiLU
    st = params["stem"]
    x = conv_bn_act(x, st["w"], st["bn"]["scale"], st["bn"]["bias"],
                    stride=2, pad=1, act="silu")

    feats = [None]
    for si, stage in enumerate(params["stages"]):
        for bi, bp in enumerate(stage["blocks"]):
            s = stage["stride"] if bi == 0 else 1
            x = mbconv_fwd(bp, x, s)
        if si in (0, 1, 2, 4):        # encoder children indices 1, 2, 3, 5
            feats.append(x)

    for dp in params["decoder"]:
        skip = feats.pop()
        x = decoder_block_fwd(dp, x, skip)

    # head: 1x1 conv with bias
    y = conv_bn_act(x, params["head_w"], params["head_scale"], params["head_b"],
                    act="id", out_dtype=jnp.float32)
    return jnp.transpose(y, (0, 3, 1, 2))     # back to NCHW


# ----------------------------------------------------------------------------
if __name__ == "__main__":
    params = init_params(seed=0)

    # spatial must be divisible by 32 (5 downsampling stages); 3 input channels.
    N, C, H, W = 2, 3, 64, 64
    x = jax.random.uniform(jax.random.PRNGKey(0), (N, C, H, W),
                           dtype=jnp.float32)

    out = efficient_unet_forward(params, x)
    out = jax.block_until_ready(out)

    assert out.shape == (N, 1, H, W), out.shape
    assert bool(jnp.all(jnp.isfinite(out)))
    print("KERNEL_OK")
</pallas_src>

<mosaic_0001>
module attributes {stable_mosaic.version = 11 : i64} {
  func.func @_matmul_fused_kernel(%arg0: i32, %arg1: memref<512x32xbf16, #tpu.memory_space<vmem>>, %arg2: memref<32x48xbf16, #tpu.memory_space<vmem>>, %arg3: memref<1x48xf32, #tpu.memory_space<vmem>>, %arg4: memref<1x48xf32, #tpu.memory_space<vmem>>, %arg5: memref<512x48xbf16, #tpu.memory_space<vmem>>) attributes {dimension_semantics = [#tpu.dimension_semantics<parallel>], iteration_bounds = array<i64: 4>, scalar_prefetch = 0 : i64, scratch_operands = 0 : i64, tpu.core_type = #tpu.core_type<tc>, window_params = [{transform_indices = @transform_0, window_bounds = array<i64: 512, 32>}, {pipeline_mode = #tpu.pipeline_mode<synchronous>, transform_indices = @transform_1, window_bounds = array<i64: 32, 48>}, {pipeline_mode = #tpu.pipeline_mode<synchronous>, transform_indices = @transform_2, window_bounds = array<i64: 1, 48>}, {pipeline_mode = #tpu.pipeline_mode<synchronous>, transform_indices = @transform_3, window_bounds = array<i64: 1, 48>}, {transform_indices = @transform_4, window_bounds = array<i64: 512, 48>}]} {
    %c0 = arith.constant 0 : index
    %c0_0 = arith.constant 0 : index
    %0 = vector.load %arg1[%c0, %c0_0] : memref<512x32xbf16, #tpu.memory_space<vmem>>, vector<512x32xbf16>
    %c0_1 = arith.constant 0 : index
    %c0_2 = arith.constant 0 : index
    %1 = vector.load %arg2[%c0_1, %c0_2] : memref<32x48xbf16, #tpu.memory_space<vmem>>, vector<32x48xbf16>
    %cst = arith.constant dense<0.000000e+00> : vector<512x48xf32>
    %2 = tpu.matmul %0, %1, %cst {dimension_numbers = #tpu.dot_dimension_numbers<[1], [0], [0], [1], [0, 0, 1, 1], [], []>} : vector<512x32xbf16>, vector<32x48xbf16>, vector<512x48xf32> -> vector<512x48xf32>
    %c0_3 = arith.constant 0 : index
    %c0_4 = arith.constant 0 : index
    %3 = vector.load %arg3[%c0_3, %c0_4] : memref<1x48xf32, #tpu.memory_space<vmem>>, vector<1x48xf32>
    %4 = vector.broadcast %3 : vector<1x48xf32> to vector<512x48xf32>
    %5 = arith.mulf %2, %4 : vector<512x48xf32>
    %c0_5 = arith.constant 0 : index
    %c0_6 = arith.constant 0 : index
    %6 = vector.load %arg4[%c0_5, %c0_6] : memref<1x48xf32, #tpu.memory_space<vmem>>, vector<1x48xf32>
    %7 = vector.broadcast %6 : vector<1x48xf32> to vector<512x48xf32>
    %8 = arith.addf %5, %7 : vector<512x48xf32>
    %9 = arith.negf %8 : vector<512x48xf32>
    %10 = math.exp %9 : vector<512x48xf32>
    %cst_7 = arith.constant 1.000000e+00 : f32
    %11 = vector.broadcast %cst_7 : f32 to vector<512x48xf32>
    %12 = arith.addf %11, %10 : vector<512x48xf32>
    %13 = arith.divf %11, %12 : vector<512x48xf32>
    %14 = arith.mulf %8, %13 : vector<512x48xf32>
    %15 = arith.truncf %14 : vector<512x48xf32> to vector<512x48xbf16>
    %c0_8 = arith.constant 0 : index
    %c0_9 = arith.constant 0 : index
    %16 = vector.load %arg5[%c0_8, %c0_9] : memref<512x48xbf16, #tpu.memory_space<vmem>>, vector<512x48xbf16>
    tpu.vector_store %arg5[%c0_8, %c0_9], %15 {strides = array<i32>} : memref<512x48xbf16, #tpu.memory_space<vmem>>, vector<512x48xbf16>,
    return
  }
  func.func @transform_0(%arg0: i32) -> (i32, i32) {
    %c0_i32 = arith.constant 0 : i32
    %c0_i32_0 = arith.constant 0 : i32
    return %arg0, %c0_i32 : i32, i32
  }
  func.func @transform_1(%arg0: i32) -> (i32, i32) {
    %c0_i32 = arith.constant 0 : i32
    %c0_i32_0 = arith.constant 0 : i32
    %c0_i32_1 = arith.constant 0 : i32
    return %c0_i32, %c0_i32_0 : i32, i32
  }
  func.func @transform_2(%arg0: i32) -> (i32, i32) {
    %c0_i32 = arith.constant 0 : i32
    %c0_i32_0 = arith.constant 0 : i32
    %c0_i32_1 = arith.constant 0 : i32
    return %c0_i32, %c0_i32_0 : i32, i32
  }
  func.func @transform_3(%arg0: i32) -> (i32, i32) {
    %c0_i32 = arith.constant 0 : i32
    %c0_i32_0 = arith.constant 0 : i32
    %c0_i32_1 = arith.constant 0 : i32
    return %c0_i32, %c0_i32_0 : i32, i32
  }
  func.func @transform_4(%arg0: i32) -> (i32, i32) {
    %c0_i32 = arith.constant 0 : i32
    %c0_i32_0 = arith.constant 0 : i32
    return %arg0, %c0_i32 : i32, i32
  }
}

</mosaic_0001>

<bundles_post_ra>
// kernel: run.1
= control target key start
LH: loop header
LB: loop body
LE: loop exit
PB: predicated region body
PF: predicated region fallthrough
CT: control target
= control target key end

     0   :  { %9 = vsyncpa [#allocation3], 0  ;;  %s3405_s0 = inlined_call_operand.vmem [shape: bf16[2048,32], index: 0, kind: input, shape index: {}]   ;;  %s3406_s1 = inlined_call_operand.vmem [shape: bf16[32,48], index: 1, kind: input, shape index: {}]   ;;  %s3407_s2 = inlined_call_operand.vmem [shape: f32[1,48], index: 2, kind: input, shape index: {}]   ;;  %s3408_s3 = inlined_call_operand.vmem [shape: f32[1,48], index: 3, kind: input, shape index: {}]   ;;  %s3409_s4 = inlined_call_operand.hbm [shape: bf16[2048,48], index: 4, kind: output, shape index: {}]  }
   0x1   :  { %11 = vsyncpa [#allocation3 + $0x1], 0  ;;  %s2615_s15 = smov 0   ;;  %s2617_s16 = smov 0  }
   0x2   :  { %s2619_s17 = smov 0   ;;  %s2621_s18 = smov 0  }
   0x3 LB: > { %s2636_s19 = sadd.s32 4294967295, %s2585_s18   ;;  %s1813_s20 = sadd.s32 4294967294, %s2585_s18   ;;  %s2585_s18 = sphi %s2621_s18, %s3415_s18   ;;  %s2581_s17 = sphi %s2619_s17, %s3414_s17   ;;  %s2577_s16 = sphi %s2617_s16, %s3413_s16   ;;  %s2573_s15 = sphi %s2615_s15, %s3412_s15  }
   0x4   : > { %s2640_s21 = sadd.s32 1, %s2585_s18   ;;  %s113_s22 = sadd.s32 1, %s2581_s17 }
   0x5   : > { %s110_s23 = ssub.s32 %s2585_s18, %s2640_s21  ;;  %p123_p0 = scmp.ne.s32.totalorder %s2581_s17, %s2577_s16 }
   0x6   : > { %p111_p1 = scmp.eq.s32.totalorder %s110_s23, 0  ;;  %p124_p2 = scmp.eq.s32.totalorder %s2636_s19, 3 }
   0x7   : > { %p129_p3 = scmp.ne.s32.totalorder %s2577_s16, %s2573_s15  ;;  %p130_p4 = scmp.eq.s32.totalorder %s1813_s20, 3 }
   0x8   : > { %s2651_s24 = scalar_select %p111_p1, %s2581_s17, %s113_s22  }
   0x9   : > { %p2653_p5 = por %p124_p2, %p123_p0  ;;  %p2657_p6 = por %p130_p4, %p129_p3 }
   0xa   : > { %p1816_p7 = scmp.ge.s32.totalorder %s2585_s18, 1  ;;  %p166_p8 = scmp.lt.s32.totalorder %s2585_s18, 5 }
   0xc   : > { %p167_p9 = pnand %p1816_p7, %p166_p8 }
   0xd   : > { %s1818_s29 = sshll.u32 (!%p167_p9), %s2636_s19, 6  ;;  %s189_s14 = sand.u32 (!%p167_p9), 1, %s2577_s16  }
   0xe   : > { %170 = sbr.rel (%p167_p9) target bundleno = 386 (0x182), region = 36  ;;  %p193_p10 = scmp.lt.s32.totalorder (!%p167_p9), %s1818_s29, 255 }
   0xf   : > { %s2894_s20 = sshll.u32 (!%p167_p9), %s189_s14, 8  ;;  %s2085_s30 = sshll.u32 (!%p167_p9), %s2636_s19, 12 }
  0x10   : > { %s2923_s22 = scalar_lea.vmem (!%p167_p9), [#allocation2], %s2894_s20  ;;  %s3353_s7 = scalar_lea.hbm (!%p167_p9), %s3409_s4, %s2085_s30 }
  0x11   : > { %s1751_s5 = sshll.u32 (!%p167_p9), %s2923_s22, 4  ;;  %s3365_s8 = scalar_lea.sflag (!%p167_p9), [#allocation3], %s189_s14  ;;  %s3355_s5 = int_to_ptr.vmem [resolvable:$true] %s1751_s5 }
  0x12   : > { %s2587_s10 = smov (!%p167_p9), [#allocation2]  }
  0x13   : > { %v2233_v0 = vld [vmem:[%s3406_s1 + $0x8] sm:$0xff]   ;;  %v2234_v1 = vld [vmem:[%s3406_s1] sm:$0xff]   ;;  %s3417_s29 = smov (!%p193_p10, %s1818_s29), 255  ;;  %vm440_vm0 = vcmask 261120   ;;  %vm1672_vm1 = vcmask 388096   ;;  %s2529_s11 = sshll.u32 %s2587_s10, 4  ;;  %s2530_s11 = int_to_ptr.vmem [resolvable:$false] %s2529_s11 }
  0x14   : > { %2120 = vmatprep.subr.bf16.mxu0 %v2233_v0  ;;  %2188 = vmatprep.subr.bf16.mxu1 %v2233_v0  ;;  %s1819_s6 = sshll.u32 %s3417_s29, 2  ;;  %v2742_v34 = vld [vmem:[%s3407_s2] ss:$0 sm:$0xff]  ;;  %s2531_s12 = scalar_lea.vmem %s2530_s11, 8192 }
  0x15   : > { %2121 = vmatpush3.bf16.msra.mxu0 %v2233_v0  ;;  %2190 = vmatpush3.bf16.msra.mxu1 %v2233_v0  ;;  %s2673_s9 = scalar_lea.vmem %s3405_s0, %s1819_s6  ;;  %v2747_v36 = vld [vmem:[%s3408_s3] ss:$0 sm:$0xff]  ;;  %p2532_p0 = scmp.lt.s32.totalorder %s3355_s5, %s2530_s11 }
  0x16   : > { %2122 = vmatprep.subr.bf16.mxu0 %v2234_v1  ;;  %2189 = vmatprep.subr.bf16.mxu1 %v2234_v1  ;;  %v2235_v2 = vld [vmem:[%s2673_s9] sm:$0xff]   ;;  %v2237_v4 = vld [vmem:[%s2673_s9 + $0x8] sm:$0xff]   ;;  %v2239_v6 = vld [vmem:[%s2673_s9 + $0x10] sm:$0xff]  }
  0x17   : > { %v2236_v3 = vld [vmem:[%s2673_s9 + $0x80] sm:$0xff]   ;;  %2124 = vmatprep.mubr.msk.bf16.mxu0 %vm440_vm0, %v2235_v2  ;;  %v2238_v5 = vld [vmem:[%s2673_s9 + $0x88] sm:$0xff]   ;;  %v2240_v7 = vld [vmem:[%s2673_s9 + $0x90] sm:$0xff]  }
  0x18   : > { %2156 = vmatprep.mubr.msk.bf16.mxu1 %vm440_vm0, %v2236_v3  ;;  %v2241_v8 = vld [vmem:[%s2673_s9 + $0x18] sm:$0xff]   ;;  %v2243_v10 = vld [vmem:[%s2673_s9 + $0x20] sm:$0xff]   ;;  %v2245_v12 = vld [vmem:[%s2673_s9 + $0x28] sm:$0xff]  }
  0x19   : > { %2123 = vmatpush3.bf16.msra.mxu0 %v2234_v1  ;;  %2191 = vmatpush3.bf16.msra.mxu1 %v2234_v1  ;;  %v2242_v9 = vld [vmem:[%s2673_s9 + $0x98] sm:$0xff]   ;;  %v2244_v11 = vld [vmem:[%s2673_s9 + $0xa0] sm:$0xff]   ;;  %v2246_v13 = vld [vmem:[%s2673_s9 + $0xa8] sm:$0xff]  }
  0x1a   : > { %v2247_v14 = vld [vmem:[%s2673_s9 + $0x30] sm:$0xff]   ;;  %v2249_v16 = vld [vmem:[%s2673_s9 + $0x38] sm:$0xff]   ;;  %v2251_v18 = vld [vmem:[%s2673_s9 + $0x40] sm:$0xff]  }
  0x1b   : > { %v2248_v15 = vld [vmem:[%s2673_s9 + $0xb0] sm:$0xff]   ;;  %v2250_v17 = vld [vmem:[%s2673_s9 + $0xb8] sm:$0xff]   ;;  %v2252_v19 = vld [vmem:[%s2673_s9 + $0xc0] sm:$0xff]  }
  0x1c   : > { %2125 = vmatmul.mubr.msk.bf16.vlgmr.msra.gmra.mxu0 %vm440_vm0, %v2237_v4  ;;  %2157 = vmatmul.mubr.msk.bf16.vlgmr.msra.gmra.mxu1 %vm440_vm0, %v2238_v5  ;;  %v2253_v20 = vld [vmem:[%s2673_s9 + $0x48] sm:$0xff]   ;;  %v2255_v22 = vld [vmem:[%s2673_s9 + $0x50] sm:$0xff]   ;;  %v2257_v24 = vld [vmem:[%s2673_s9 + $0x58] sm:$0xff]  }
  0x1d   : > { %2128 = vmatprep.mubr.msk.bf16.mxu0 %vm440_vm0, %v2239_v6  ;;  %2160 = vmatprep.mubr.msk.bf16.mxu1 %vm440_vm0, %v2240_v7  ;;  %v2254_v21 = vld [vmem:[%s2673_s9 + $0xc8] sm:$0xff]   ;;  %v2256_v23 = vld [vmem:[%s2673_s9 + $0xd0] sm:$0xff]   ;;  %v2258_v25 = vld [vmem:[%s2673_s9 + $0xd8] sm:$0xff]  }
  0x1e   : > { %v2259_v26 = vld [vmem:[%s2673_s9 + $0x60] sm:$0xff]   ;;  %v2261_v28 = vld [vmem:[%s2673_s9 + $0x68] sm:$0xff]   ;;  %v2263_v30 = vld [vmem:[%s2673_s9 + $0x70] sm:$0xff]  }
  0x1f   : > { %v2260_v27 = vld [vmem:[%s2673_s9 + $0xe0] sm:$0xff]   ;;  %v2262_v29 = vld [vmem:[%s2673_s9 + $0xe8] sm:$0xff]   ;;  %v2264_v31 = vld [vmem:[%s2673_s9 + $0xf0] sm:$0xff]  }
  0x20   : > { %v2265_v32 = vld [vmem:[%s2673_s9 + $0x78] sm:$0xff]  }
  0x21   : > { %v2266_v33 = vld [vmem:[%s2673_s9 + $0xf8] sm:$0xff]   ;;  %s2525_s9 = scalar_lea.vmem %s3355_s5, 4096 }
  0x22   : > { %p2526_p11 = scmp.ne.s32.totalorder %s3355_s5, %s2525_s9  ;;  %p2533_p1 = scmp.lt.s32.totalorder %s2531_s12, %s2525_s9 }
  0x24   : > { %2129 = vmatmul.mubr.msk.bf16.gmra.mxu0 %vm440_vm0, %v2241_v8  ;;  %2161 = vmatmul.mubr.msk.bf16.gmra.mxu1 %vm440_vm0, %v2242_v9  ;;  %p2527_p12 = pnand %p2526_p11, %p2653_p5  ;;  %p2534_p2 = por %p2533_p1, %p2532_p0 }
  0x25   : > { %2132 = vmatprep.mubr.msk.bf16.mxu0 %vm440_vm0, %v2243_v10  ;;  %2164 = vmatprep.mubr.msk.bf16.mxu1 %vm440_vm0, %v2244_v11 }
  0x26   : > { %p2528_p13 = pneg %p2527_p12 }
  0x28   : > { %p2535_p3 = pnand %p2534_p2, %p2528_p13 }
  0x2c   : > { %2133 = vmatmul.mubr.msk.bf16.gmra.mxu0 %vm440_vm0, %v2245_v12  ;;  %2165 = vmatmul.mubr.msk.bf16.gmra.mxu1 %vm440_vm0, %v2246_v13 }
  0x2d   : > { %2136 = vmatprep.mubr.msk.bf16.mxu0 %vm440_vm0, %v2247_v14  ;;  %2168 = vmatprep.mubr.msk.bf16.mxu1 %vm440_vm0, %v2248_v15 }
  0x34   : > { %2137 = vmatmul.mubr.msk.bf16.gmra.mxu0 %vm440_vm0, %v2249_v16  ;;  %2169 = vmatmul.mubr.msk.bf16.gmra.mxu1 %vm440_vm0, %v2250_v17 }
  0x35   : > { %2140 = vmatprep.mubr.msk.bf16.mxu0 %vm440_vm0, %v2251_v18  ;;  %2172 = vmatprep.mubr.msk.bf16.mxu1 %vm440_vm0, %v2252_v19 }
  0x3c   : > { %2141 = vmatmul.mubr.msk.bf16.gmra.mxu0 %vm440_vm0, %v2253_v20  ;;  %2173 = vmatmul.mubr.msk.bf16.gmra.mxu1 %vm440_vm0, %v2254_v21 }
  0x3d   : > { %2144 = vmatprep.mubr.msk.bf16.mxu0 %vm440_vm0, %v2255_v22  ;;  %2176 = vmatprep.mubr.msk.bf16.mxu1 %vm440_vm0, %v2256_v23 }
  0x44   : > { %2145 = vmatmul.mubr.msk.bf16.gmra.mxu0 %vm440_vm0, %v2257_v24  ;;  %2177 = vmatmul.mubr.msk.bf16.gmra.mxu1 %vm440_vm0, %v2258_v25 }
  0x45   : > { %2148 = vmatprep.mubr.msk.bf16.mxu0 %vm440_vm0, %v2259_v26  ;;  %2180 = vmatprep.mubr.msk.bf16.mxu1 %vm440_vm0, %v2260_v27 }
  0x4c   : > { %2149 = vmatmul.mubr.msk.bf16.gmra.mxu0 %vm440_vm0, %v2261_v28  ;;  %2181 = vmatmul.mubr.msk.bf16.gmra.mxu1 %vm440_vm0, %v2262_v29 }
  0x4d   : > { %2152 = vmatprep.mubr.msk.bf16.mxu0 %vm440_vm0, %v2263_v30  ;;  %2184 = vmatprep.mubr.msk.bf16.mxu1 %vm440_vm0, %v2264_v31 }
  0x54   : > { %2153 = vmatmul.mubr.msk.bf16.gmra.mxu0 %vm440_vm0, %v2265_v32  ;;  %2185 = vmatmul.mubr.msk.bf16.gmra.mxu1 %vm440_vm0, %v2266_v33 }
  0xdc   : > { %v2126_v35 = vpop.f32.mrf.mxu0  ;;  %v2158_v38 = vpop.f32.mrf.mxu1 }
  0xdd   : > { %v835_v37 = vmul.f32 %v2126_v35, %v2742_v34  ;;  %v867_v39 = vmul.f32 %v2158_v38, %v2742_v34 }
  0xde   : > { %v571_v40 = vpop.f32.mrf.mxu0  ;;  %v699_v43 = vpop.f32.mrf.mxu1 }
  0xdf   : > { %v2752_v41 = vadd.f32 %v2747_v36, %v835_v37  ;;  %v833_v42 = vmul.f32 %v2742_v34, %v571_v40  ;;  %v2756_v44 = vadd.f32 %v2747_v36, %v867_v39  ;;  %v865_v45 = vmul.f32 %v2742_v34, %v699_v43 }
  0xe0   : > { %v2127_v46 = vpop.f32.mrf.mxu0  ;;  %v2159_v50 = vpop.f32.mrf.mxu1 }
  0xe1   : > { %v1890_v47 = vmul.f32 -1.442695, %v2752_v41  ;;  %v2761_v48 = vadd.f32 %v2747_v36, %v833_v42  ;;  %v836_v49 = vmul.f32 %v2127_v46, %v2742_v34  ;;  %v1922_v51 = vmul.f32 -1.442695, %v2756_v44 }
  0xe2   : > { %v2766_v52 = vadd.f32 %v2747_v36, %v865_v45  ;;  %v868_v53 = vmul.f32 %v2159_v50, %v2742_v34  ;;  %v574_v54 = vpop.f32.mrf.mxu0  ;;  %v702_v58 = vpop.f32.mrf.mxu1 }
  0xe3   : > { %2267 = vpow2.f32 %v1890_v47  ;;  %v1888_v55 = vmul.f32 -1.442695, %v2761_v48  ;;  %v2771_v56 = vadd.f32 %v2747_v36, %v836_v49  ;;  %v834_v57 = vmul.f32 %v2742_v34, %v574_v54 }
  0xe4   : > { %2269 = vpow2.f32 %v1922_v51  ;;  %v1920_v59 = vmul.f32 -1.442695, %v2766_v52  ;;  %v2776_v60 = vadd.f32 %v2747_v36, %v868_v53  ;;  %v866_v61 = vmul.f32 %v2742_v34, %v702_v58  ;;  %v2130_v62 = vpop.f32.mrf.mxu0  ;;  %v2162_v2 = vpop.f32.mrf.mxu1 }
  0xe5   : > { %2271 = vpow2.f32 %v1888_v55  ;;  %v1891_v63 = vmul.f32 -1.442695, %v2771_v56  ;;  %v2781_v0 = vadd.f32 %v2747_v36, %v834_v57  ;;  %v839_v1 = vmul.f32 %v2130_v62, %v2742_v34 }
  0xe6   : > { %2273 = vpow2.f32 %v1920_v59  ;;  %v1923_v3 = vmul.f32 -1.442695, %v2776_v60  ;;  %v2786_v4 = vadd.f32 %v2747_v36, %v866_v61  ;;  %v871_v5 = vmul.f32 %v2162_v2, %v2742_v34  ;;  %v587_v6 = vpop.f32.mrf.mxu0  ;;  %v715_v10 = vpop.f32.mrf.mxu1 }
  0xe7   : > { %2275 = vpow2.f32 %v1891_v63  ;;  %v1889_v7 = vmul.f32 -1.442695, %v2781_v0  ;;  %v2791_v8 = vadd.f32 %v2747_v36, %v839_v1  ;;  %v837_v9 = vmul.f32 %v2742_v34, %v587_v6 }
  0xe8   : > { %2277 = vpow2.f32 %v1923_v3  ;;  %v1921_v11 = vmul.f32 -1.442695, %v2786_v4  ;;  %v2796_v12 = vadd.f32 %v2747_v36, %v871_v5  ;;  %v869_v13 = vmul.f32 %v2742_v34, %v715_v10  ;;  %v2131_v14 = vpop.f32.mrf.mxu0  ;;  %v2163_v18 = vpop.f32.mrf.mxu1 }
  0xe9   : > { %2279 = vpow2.f32 %v1889_v7  ;;  %v1894_v15 = vmul.f32 -1.442695, %v2791_v8  ;;  %v2801_v16 = vadd.f32 %v2747_v36, %v837_v9  ;;  %v840_v17 = vmul.f32 %v2131_v14, %v2742_v34 }
  0xea   : > { %2281 = vpow2.f32 %v1921_v11  ;;  %v1926_v19 = vmul.f32 -1.442695, %v2796_v12  ;;  %v2806_v20 = vadd.f32 %v2747_v36, %v869_v13  ;;  %v872_v21 = vmul.f32 %v2163_v18, %v2742_v34  ;;  %v590_v22 = vpop.f32.mrf.mxu0  ;;  %v718_v26 = vpop.f32.mrf.mxu1 }
  0xeb   : > { %2283 = vpow2.f32 %v1894_v15  ;;  %v1892_v23 = vmul.f32 -1.442695, %v2801_v16  ;;  %v2811_v24 = vadd.f32 %v2747_v36, %v840_v17  ;;  %v838_v25 = vmul.f32 %v2742_v34, %v590_v22 }
  0xec   : > { %2285 = vpow2.f32 %v1926_v19  ;;  %v1924_v27 = vmul.f32 -1.442695, %v2806_v20  ;;  %v2816_v28 = vadd.f32 %v2747_v36, %v872_v21  ;;  %v870_v29 = vmul.f32 %v2742_v34, %v718_v26  ;;  %v2134_v30 = vpop.f32.mrf.mxu0  ;;  %v2166_v35 = vpop.f32.mrf.mxu1 }
  0xed   : > { %2287 = vpow2.f32 %v1892_v23  ;;  %v1895_v31 = vmul.f32 -1.442695, %v2811_v24  ;;  %v2821_v32 = vadd.f32 %v2747_v36, %v838_v25  ;;  %v843_v33 = vmul.f32 %v2134_v30, %v2742_v34 }
  0xee   : > { %2289 = vpow2.f32 %v1924_v27  ;;  %v1927_v37 = vmul.f32 -1.442695, %v2816_v28  ;;  %v2826_v38 = vadd.f32 %v2747_v36, %v870_v29  ;;  %v875_v39 = vmul.f32 %v2166_v35, %v2742_v34  ;;  %v603_v40 = vpop.f32.mrf.mxu0  ;;  %v731_v45 = vpop.f32.mrf.mxu1 }
  0xef   : > { %2291 = vpow2.f32 %v1895_v31  ;;  %v1893_v42 = vmul.f32 -1.442695, %v2821_v32  ;;  %v841_v43 = vmul.f32 %v2742_v34, %v603_v40  ;;  %v873_v49 = vmul.f32 %v2742_v34, %v731_v45 }
  0xf0   : > { %v2268_v46 = vpop.eup %2267  ;;  %2293 = vpow2.f32 %v1927_v37  ;;  %v1925_v47 = vmul.f32 -1.442695, %v2826_v38  ;;  %v2135_v50 = vpop.f32.mrf.mxu0  ;;  %v2834_v54 = vadd.f32 %v2747_v36, %v843_v33  ;;  %v2837_v59 = vadd.f32 %v2747_v36, %v875_v39 }
  0xf1   : > { %v2270_v51 = vpop.eup %2269  ;;  %v1162_v53 = vadd.f32 1.0, %v2268_v46  ;;  %2295 = vpow2.f32 %v1893_v42  ;;  %v2167_v55 = vpop.f32.mrf.mxu1  ;;  %v2840_v1 = vadd.f32 %v2747_v36, %v841_v43  ;;  %v2843_v2 = vadd.f32 %v2747_v36, %v873_v49 }
  0xf2   : > { %v2272_v57 = vpop.eup %2271  ;;  %v1194_v58 = vadd.f32 1.0, %v2270_v51  ;;  %2297 = vpow2.f32 %v1925_v47  ;;  %v606_v61 = vpop.f32.mrf.mxu0  ;;  %v844_v7 = vmul.f32 %v2135_v50, %v2742_v34  ;;  %v876_v9 = vmul.f32 %v2167_v55, %v2742_v34 }
  0xf3   : > { %v2274_v62 = vpop.eup %2273  ;;  %2299 = vrcp.f32 %v1162_v53  ;;  %v1160_v63 = vadd.f32 1.0, %v2272_v57  ;;  %v734_v3 = vpop.f32.mrf.mxu1  ;;  %v2848_v14 = vmul.f32 -1.442695, %v2834_v54  ;;  %v842_v15 = vmul.f32 %v2742_v34, %v606_v61 }
  0xf4   : > { %v2276_v5 = vpop.eup %2275  ;;  %2301 = vrcp.f32 %v1194_v58  ;;  %v1192_v6 = vadd.f32 1.0, %v2274_v62  ;;  %v2138_v10 = vpop.f32.mrf.mxu0  ;;  %v2852_v21 = vmul.f32 -1.442695, %v2837_v59  ;;  %v874_v22 = vmul.f32 %v2742_v34, %v734_v3 }
  0xf5   : > { %v2278_v11 = vpop.eup %2277  ;;  %2303 = vrcp.f32 %v1160_v63  ;;  %v1163_v13 = vadd.f32 1.0, %v2276_v5  ;;  %v2170_v17 = vpop.f32.mrf.mxu1  ;;  %v2856_v26 = vmul.f32 -1.442695, %v2840_v1  ;;  %v2859_v27 = vmul.f32 -1.442695, %v2843_v2 }
  0xf6   : > { %v2280_v18 = vpop.eup %2279  ;;  %2305 = vrcp.f32 %v1192_v6  ;;  %v1195_v19 = vadd.f32 1.0, %v2278_v11  ;;  %v2862_v31 = vadd.f32 %v2747_v36, %v844_v7  ;;  %v2865_v33 = vadd.f32 %v2747_v36, %v876_v9  ;;  %v619_v35 = vpop.f32.mrf.mxu0 }
  0xf7   : > { %v2282_v23 = vpop.eup %2281  ;;  %2307 = vrcp.f32 %v1163_v13  ;;  %v1161_v25 = vadd.f32 1.0, %v2280_v18  ;;  %v2868_v40 = vadd.f32 %v2747_v36, %v842_v15  ;;  %v847_v42 = vmul.f32 %v2138_v10, %v2742_v34  ;;  %v747_v43 = vpop.f32.mrf.mxu1 }
  0xf8   : > { %v2284_v29 = vpop.eup %2283  ;;  %2309 = vrcp.f32 %v1195_v19  ;;  %v1193_v30 = vadd.f32 1.0, %v2282_v23  ;;  %v2872_v47 = vadd.f32 %v2747_v36, %v874_v22  ;;  %v879_v49 = vmul.f32 %v2170_v17, %v2742_v34  ;;  %v2139_v63 = vpop.f32.mrf.mxu0 }
  0xf9   : > { %v2286_v37 = vpop.eup %2285  ;;  %2311 = vrcp.f32 %v1161_v25  ;;  %v1166_v39 = vadd.f32 1.0, %v2284_v29  ;;  %v2876_v53 = vadd.f32 %v2747_v36, %v847_v42  ;;  %v845_v55 = vmul.f32 %v2742_v34, %v619_v35  ;;  %v2171_v9 = vpop.f32.mrf.mxu1 }
  0xfa   : > { %v2288_v45 = vpop.eup %2287  ;;  %2313 = vrcp.f32 %v1193_v30  ;;  %v1198_v46 = vadd.f32 1.0, %v2286_v37  ;;  %v2881_v61 = vadd.f32 %v2747_v36, %v879_v49  ;;  %v877_v62 = vmul.f32 %v2742_v34, %v747_v43  ;;  %v622_v35 = vpop.f32.mrf.mxu0 }
  0xfb   : > { %v2290_v50 = vpop.eup %2289  ;;  %2315 = vrcp.f32 %v1166_v39  ;;  %v1164_v51 = vadd.f32 1.0, %v2288_v45  ;;  %v1899_v6 = vmul.f32 -1.442695, %v2862_v31  ;;  %v2886_v7 = vadd.f32 %v2747_v36, %v845_v55  ;;  %v750_v45 = vpop.f32.mrf.mxu1 }
  0xfc   : > { %v2292_v57 = vpop.eup %2291  ;;  %2317 = vrcp.f32 %v1198_v46  ;;  %v1196_v58 = vadd.f32 1.0, %v2290_v50  ;;  %v1931_v13 = vmul.f32 -1.442695, %v2865_v33  ;;  %v2890_v15 = vadd.f32 %v2747_v36, %v877_v62 }
  0xfd   : > { %v2294_v3 = vpop.eup %2293  ;;  %2319 = vrcp.f32 %v1164_v51  ;;  %v1167_v5 = vadd.f32 1.0, %v2292_v57  ;;  %v1897_v19 = vmul.f32 -1.442695, %v2868_v40  ;;  %v2898_v22 = vmul.f32 -1.442695, %v2872_v47 }
  0xfe   : > { %v2296_v10 = vpop.eup %2295  ;;  %2321 = vrcp.f32 %v1196_v58  ;;  %v1199_v11 = vadd.f32 1.0, %v2294_v3  ;;  %v2901_v29 = vmul.f32 -1.442695, %v2876_v53  ;;  %v2904_v30 = vmul.f32 -1.442695, %v2881_v61 }
  0xff   : > { %v2298_v17 = vpop.eup %2297  ;;  %2323 = vrcp.f32 %v1167_v5  ;;  %v1165_v18 = vadd.f32 1.0, %v2296_v10  ;;  %v2908_v42 = vmul.f32 -1.442695, %v2886_v7  ;;  %v848_v43 = vmul.f32 %v2139_v63, %v2742_v34  ;;  %v2142_v5 = vpop.f32.mrf.mxu0 }
 0x100   : > { %v2300_v23 = vpop.eup %2299  ;;  %2325 = vrcp.f32 %v1199_v11  ;;  %v1197_v25 = vadd.f32 1.0, %v2298_v17  ;;  %v2913_v50 = vmul.f32 -1.442695, %v2890_v15  ;;  %v880_v51 = vmul.f32 %v2171_v9, %v2742_v34 }
 0x101   : > { %v2302_v37 = vpop.eup %2301  ;;  %v1354_v39 = vmul.f32 %v2300_v23, %v2752_v41  ;;  %2327 = vrcp.f32 %v1165_v18  ;;  %v846_v58 = vmul.f32 %v2742_v34, %v622_v35 }
 0x102   : > { %v2304_v46 = vpop.eup %2303  ;;  %v1386_v49 = vmul.f32 %v2302_v37, %v2756_v44  ;;  %2329 = vrcp.f32 %v1197_v25  ;;  %v878_v44 = vmul.f32 %v2742_v34, %v750_v45  ;;  %v2937_v18 = vadd.f32 %v2747_v36, %v880_v51 }
 0x103   : > { %v2306_v55 = vpop.eup %2305  ;;  %v2023_v57 = vpack.c.bf16 %v1354_v39, %v1354_v39  ;;  %v1352_v41 = vmul.f32 %v2304_v46, %v2761_v48  ;;  %2331 = vpow2.f32 %v2848_v14  ;;  %v2943_v25 = vadd.f32 %v2747_v36, %v846_v58  ;;  %v635_v39 = vpop.f32.mrf.mxu0 }
 0x104   : > { %v2308_v62 = vpop.eup %2307  ;;  %v2055_v63 = vpack.c.bf16 %v1386_v49, %v1386_v49  ;;  %v1384_v3 = vmul.f32 %v2306_v55, %v2766_v52  ;;  %2333 = vpow2.f32 %v2852_v21  ;;  %v2930_v52 = vadd.f32 %v2747_v36, %v848_v43  ;;  %v2174_v21 = vpop.f32.mrf.mxu1 }
 0x105   : > { %v2310_v10 = vpop.eup %2309  ;;  %1675 = vst.msk [vmem:[%s2923_s22 + $0x8] sm:$0xf] %vm1672_vm1, %v2023_v57  ;;  %v2021_v48 = vpack.c.bf16 %v1352_v41, %v1352_v41  ;;  %v1355_v14 = vmul.f32 %v2308_v62, %v2771_v56  ;;  %2335 = vpow2.f32 %v2856_v26  ;;  %v2949_v37 = vadd.f32 %v2747_v36, %v878_v44  ;;  %v2143_v62 = vpop.f32.mrf.mxu0 }
 0x106   : > { %v2312_v9 = vpop.eup %2311  ;;  %1707 = vst.msk [vmem:[%s2923_s22 + $0x88] sm:$0xf] %vm1672_vm1, %v2055_v63  ;;  %v2053_v11 = vpack.c.bf16 %v1384_v3, %v1384_v3  ;;  %v1387_v17 = vmul.f32 %v2310_v10, %v2776_v60  ;;  %2337 = vpow2.f32 %v2859_v27  ;;  %v1903_v45 = vmul.f32 -1.442695, %v2930_v52  ;;  %v763_v46 = vpop.f32.mrf.mxu1 }
 0x107   : > { %v2314_v56 = vpop.eup %2313  ;;  %1673 = vst.msk [vmem:[%s2923_s22] sm:$0xf] %vm1672_vm1, %v2021_v48  ;;  %v2024_v26 = vpack.c.bf16 %v1355_v14, %v1355_v14  ;;  %v1353_v23 = vmul.f32 %v2312_v9, %v2781_v0  ;;  %2339 = vpow2.f32 %v1899_v6  ;;  %v1935_v51 = vmul.f32 -1.442695, %v2937_v18 }
 0x108   : > { %v2316_v35 = vpop.eup %2315  ;;  %1705 = vst.msk [vmem:[%s2923_s22 + $0x80] sm:$0xf] %vm1672_vm1, %v2053_v11  ;;  %v2056_v60 = vpack.c.bf16 %v1387_v17, %v1387_v17  ;;  %v1385_v27 = vmul.f32 %v2314_v56, %v2786_v4  ;;  %2341 = vpow2.f32 %v1931_v13  ;;  %v1901_v57 = vmul.f32 -1.442695, %v2943_v25  ;;  %v2175_v44 = vpop.f32.mrf.mxu1 }
 0x109   : > { %v2318_v43 = vpop.eup %2317  ;;  %1676 = vst.msk [vmem:[%s2923_s22 + $0xc] sm:$0xf] %vm1672_vm1, %v2024_v26  ;;  %v2022_v0 = vpack.c.bf16 %v1353_v23, %v1353_v23  ;;  %v1358_v6 = vmul.f32 %v2316_v35, %v2791_v8  ;;  %2343 = vpow2.f32 %v1897_v19  ;;  %v1933_v58 = vmul.f32 -1.442695, %v2949_v37 }
 0x10a   : > { %v2320_v49 = vpop.eup %2319  ;;  %1708 = vst.msk [vmem:[%s2923_s22 + $0x8c] sm:$0xf] %vm1672_vm1, %v2056_v60  ;;  %v2054_v4 = vpack.c.bf16 %v1385_v27, %v1385_v27  ;;  %v1390_v13 = vmul.f32 %v2318_v43, %v2796_v12  ;;  %2345 = vpow2.f32 %v2898_v22  ;;  %v851_v3 = vmul.f32 %v2142_v5, %v2742_v34  ;;  %v766_v23 = vpop.f32.mrf.mxu1 }
 0x10b   : > { %v2322_v55 = vpop.eup %2321  ;;  %1674 = vst.msk [vmem:[%s2923_s22 + $0x4] sm:$0xf] %vm1672_vm1, %v2022_v0  ;;  %v2027_v8 = vpack.c.bf16 %v1358_v6, %v1358_v6  ;;  %v1356_v19 = vmul.f32 %v2320_v49, %v2801_v16  ;;  %2347 = vpow2.f32 %v2901_v29  ;;  %v883_v48 = vmul.f32 %v2174_v21, %v2742_v34  ;;  %v638_v21 = vpop.f32.mrf.mxu0 }
 0x10c   : > { %v2324_v41 = vpop.eup %2323  ;;  %1706 = vst.msk [vmem:[%s2923_s22 + $0x84] sm:$0xf] %vm1672_vm1, %v2054_v4  ;;  %v2059_v12 = vpack.c.bf16 %v1390_v13, %v1390_v13  ;;  %v1388_v22 = vmul.f32 %v2322_v55, %v2806_v20  ;;  %2349 = vpow2.f32 %v2904_v30  ;;  %v849_v5 = vmul.f32 %v2742_v34, %v635_v39 }
 0x10d   : > { %v2326_v63 = vpop.eup %2325  ;;  %1679 = vst.msk [vmem:[%s2923_s22 + $0x18] sm:$0xf] %vm1672_vm1, %v2027_v8  ;;  %v2025_v16 = vpack.c.bf16 %v1356_v19, %v1356_v19  ;;  %v1359_v29 = vmul.f32 %v2324_v41, %v2811_v24  ;;  %2351 = vpow2.f32 %v2908_v42  ;;  %v2991_v26 = vadd.f32 %v2747_v36, %v851_v3  ;;  %v2146_v13 = vpop.f32.mrf.mxu0 }
 0x10e   : > { %v2328_v10 = vpop.eup %2327  ;;  %1711 = vst.msk [vmem:[%s2923_s22 + $0x98] sm:$0xf] %vm1672_vm1, %v2059_v12  ;;  %v2057_v20 = vpack.c.bf16 %v1388_v22, %v1388_v22  ;;  %v1391_v30 = vmul.f32 %v2326_v63, %v2816_v28  ;;  %2353 = vpow2.f32 %v2913_v50  ;;  %v881_v50 = vmul.f32 %v2742_v34, %v763_v46 }
 0x10f   : > { %v2330_v14 = vpop.eup %2329  ;;  %1677 = vst.msk [vmem:[%s2923_s22 + $0x10] sm:$0xf] %vm1672_vm1, %v2025_v16  ;;  %v2028_v24 = vpack.c.bf16 %v1359_v29, %v1359_v29  ;;  %v1357_v42 = vmul.f32 %v2328_v10, %v2821_v32  ;;  %2355 = vpow2.f32 %v1903_v45  ;;  %v2996_v27 = vadd.f32 %v2747_v36, %v883_v48 }
 0x110   : > { %v2332_v9 = vpop.eup %2331  ;;  %1709 = vst.msk [vmem:[%s2923_s22 + $0x90] sm:$0xf] %vm1672_vm1, %v2057_v20  ;;  %v2060_v11 = vpack.c.bf16 %v1391_v30, %v1391_v30  ;;  %v1389_v28 = vmul.f32 %v2330_v14, %v2826_v38  ;;  %2357 = vpow2.f32 %v1935_v51  ;;  %v3001_v0 = vadd.f32 %v2747_v36, %v849_v5  ;;  %v651_v30 = vpop.f32.mrf.mxu0 }
 0x111   : > { %v2334_v17 = vpop.eup %2333  ;;  %1680 = vst.msk [vmem:[%s2923_s22 + $0x1c] sm:$0xf] %vm1672_vm1, %v2028_v24  ;;  %v2026_v56 = vpack.c.bf16 %v1357_v42, %v1357_v42  ;;  %v1170_v32 = vadd.f32 1.0, %v2332_v9  ;;  %2359 = vpow2.f32 %v1901_v57  ;;  %v3004_v6 = vadd.f32 %v2747_v36, %v881_v50  ;;  %v2178_v57 = vpop.f32.mrf.mxu1 }
 0x112   : > { %v2336_v35 = vpop.eup %2335  ;;  %1712 = vst.msk [vmem:[%s2923_s22 + $0x9c] sm:$0xf] %vm1672_vm1, %v2060_v11  ;;  %v2058_v38 = vpack.c.bf16 %v1389_v28, %v1389_v28  ;;  %v1202_v60 = vadd.f32 1.0, %v2334_v17  ;;  %2361 = vpow2.f32 %v1933_v58  ;;  %v852_v49 = vmul.f32 %v2143_v62, %v2742_v34 }
 0x113   : > { %v2338_v39 = vpop.eup %2337  ;;  %1678 = vst.msk [vmem:[%s2923_s22 + $0x14] sm:$0xf] %vm1672_vm1, %v2026_v56  ;;  %2363 = vrcp.f32 %v1170_v32  ;;  %v1168_v43 = vadd.f32 1.0, %v2336_v35  ;;  %v884_v4 = vmul.f32 %v2175_v44, %v2742_v34  ;;  %v3011_v8 = vmul.f32 -1.442695, %v2991_v26  ;;  %v779_v5 = vpop.f32.mrf.mxu1 }
 0x114   : > { %v2340_v45 = vpop.eup %2339  ;;  %1710 = vst.msk [vmem:[%s2923_s22 + $0x94] sm:$0xf] %vm1672_vm1, %v2058_v38  ;;  %2365 = vrcp.f32 %v1202_v60  ;;  %v1200_v46 = vadd.f32 1.0, %v2338_v39  ;;  %v850_v19 = vmul.f32 %v2742_v34, %v638_v21  ;;  %v3015_v22 = vmul.f32 -1.442695, %v2996_v27  ;;  %v2147_v39 = vpop.f32.mrf.mxu0 }
 0x115   : > { %v2342_v51 = vpop.eup %2341  ;;  %2367 = vrcp.f32 %v1168_v43  ;;  %v1171_v55 = vadd.f32 1.0, %v2340_v45  ;;  %v882_v58 = vmul.f32 %v2742_v34, %v766_v23  ;;  %v3019_v16 = vmul.f32 -1.442695, %v3001_v0 }
 0x116   : > { %v2344_v41 = vpop.eup %2343  ;;  %2369 = vrcp.f32 %v1200_v46  ;;  %v1203_v12 = vadd.f32 1.0, %v2342_v51  ;;  %v3022_v29 = vmul.f32 -1.442695, %v3004_v6  ;;  %v3025_v10 = vadd.f32 %v2747_v36, %v852_v49 }
 0x117   : > { %v2346_v62 = vpop.eup %2345  ;;  %2371 = vrcp.f32 %v1171_v55  ;;  %v1169_v63 = vadd.f32 1.0, %v2344_v41  ;;  %v3028_v20 = vadd.f32 %v2747_v36, %v884_v4  ;;  %v3031_v24 = vadd.f32 %v2747_v36, %v850_v19  ;;  %v2179_v4 = vpop.f32.mrf.mxu1 }
 0x118   : > { %v2348_v3 = vpop.eup %2347  ;;  %2373 = vrcp.f32 %v1203_v12  ;;  %v1201_v44 = vadd.f32 1.0, %v2346_v62  ;;  %v855_v42 = vmul.f32 %v2146_v13, %v2742_v34  ;;  %v3035_v28 = vadd.f32 %v2747_v36, %v882_v58 }
 0x119   : > { %v2350_v48 = vpop.eup %2349  ;;  %2375 = vrcp.f32 %v1169_v63  ;;  %v1174_v14 = vadd.f32 1.0, %v2348_v3  ;;  %v887_v50 = vmul.f32 %v2178_v57, %v2742_v34  ;;  %v853_v32 = vmul.f32 %v2742_v34, %v651_v30  ;;  %v654_v30 = vpop.f32.mrf.mxu0 }
 0x11a   : > { %v2352_v9 = vpop.eup %2351  ;;  %2377 = vrcp.f32 %v1201_v44  ;;  %v1206_v11 = vadd.f32 1.0, %v2350_v48  ;;  %v3039_v56 = vadd.f32 %v2747_v36, %v855_v42  ;;  %v885_v60 = vmul.f32 %v2742_v34, %v779_v5 }
 0x11b   : > { %v2354_v21 = vpop.eup %2353  ;;  %2379 = vrcp.f32 %v1174_v14  ;;  %v1172_v17 = vadd.f32 1.0, %v2352_v9  ;;  %v3043_v38 = vadd.f32 %v2747_v36, %v887_v50  ;;  %v1907_v46 = vmul.f32 -1.442695, %v3025_v10  ;;  %v782_v9 = vpop.f32.mrf.mxu1 }
 0x11c   : > { %v2356_v23 = vpop.eup %2355  ;;  %2381 = vrcp.f32 %v1206_v11  ;;  %v1204_v35 = vadd.f32 1.0, %v2354_v21  ;;  %v3048_v49 = vadd.f32 %v2747_v36, %v853_v32  ;;  %v1939_v55 = vmul.f32 -1.442695, %v3028_v20 }
 0x11d   : > { %v2358_v43 = vpop.eup %2357  ;;  %2383 = vrcp.f32 %v1172_v17  ;;  %v1175_v45 = vadd.f32 1.0, %v2356_v23  ;;  %v3052_v19 = vadd.f32 %v2747_v36, %v885_v60  ;;  %v1905_v12 = vmul.f32 -1.442695, %v3031_v24 }
 0x11e   : > { %v2360_v13 = vpop.eup %2359  ;;  %2385 = vrcp.f32 %v1204_v35  ;;  %v1207_v51 = vadd.f32 1.0, %v2358_v43  ;;  %v3056_v58 = vmul.f32 -1.442695, %v3035_v28  ;;  %v3059_v3 = vmul.f32 -1.442695, %v3039_v56 }
 0x11f   : > { %v2362_v57 = vpop.eup %2361  ;;  %2387 = vrcp.f32 %v1175_v45  ;;  %v1173_v41 = vadd.f32 1.0, %v2360_v13  ;;  %v3062_v44 = vmul.f32 -1.442695, %v3043_v38  ;;  %v3066_v42 = vmul.f32 -1.442695, %v3048_v49  ;;  %v2150_v45 = vpop.f32.mrf.mxu0 }
 0x120   : > { %v2364_v62 = vpop.eup %2363  ;;  %2389 = vrcp.f32 %v1207_v51  ;;  %v1205_v63 = vadd.f32 1.0, %v2362_v57  ;;  %v856_v5 = vmul.f32 %v2147_v39, %v2742_v34  ;;  %v3071_v21 = vmul.f32 -1.442695, %v3052_v19  ;;  %v2182_v51 = vpop.f32.mrf.mxu1 }
 0x121   : > { %v2366_v48 = vpop.eup %2365  ;;  %v1362_v14 = vmul.f32 %v2364_v62, %v2834_v54  ;;  %2391 = vrcp.f32 %v1173_v41  ;;  %v888_v17 = vmul.f32 %v2179_v4, %v2742_v34  ;;  %v854_v35 = vmul.f32 %v2742_v34, %v654_v30 }
 0x122   : > { %v2368_v11 = vpop.eup %2367  ;;  %v1394_v50 = vmul.f32 %v2366_v48, %v2837_v59  ;;  %2393 = vrcp.f32 %v1205_v63  ;;  %v886_v43 = vmul.f32 %v2742_v34, %v782_v9 }
 0x123   : > { %v2370_v32 = vpop.eup %2369  ;;  %v2031_v23 = vpack.c.bf16 %v1362_v14, %v1362_v14  ;;  %v1360_v54 = vmul.f32 %v2368_v11, %v2840_v1  ;;  %2395 = vpow2.f32 %v3011_v8  ;;  %v3085_v8 = vadd.f32 %v2747_v36, %v856_v5  ;;  %v667_v14 = vpop.f32.mrf.mxu0 }
 0x124   : > { %v2372_v60 = vpop.eup %2371  ;;  %v2063_v39 = vpack.c.bf16 %v1394_v50, %v1394_v50  ;;  %v1392_v59 = vmul.f32 %v2370_v32, %v2843_v2  ;;  %2397 = vpow2.f32 %v3015_v22  ;;  %v3092_v41 = vadd.f32 %v2747_v36, %v888_v17  ;;  %v795_v11 = vpop.f32.mrf.mxu1 }
 0x125   : > { %v2374_v4 = vpop.eup %2373  ;;  %1683 = vst.msk [vmem:[%s2923_s22 + $0x28] sm:$0xf] %vm1672_vm1, %v2031_v23  ;;  %v2029_v13 = vpack.c.bf16 %v1360_v54, %v1360_v54  ;;  %v1363_v1 = vmul.f32 %v2372_v60, %v2862_v31  ;;  %2399 = vpow2.f32 %v3019_v16  ;;  %v3098_v63 = vadd.f32 %v2747_v36, %v854_v35  ;;  %v2151_v60 = vpop.f32.mrf.mxu0 }
 0x126   : > { %v2376_v2 = vpop.eup %2375  ;;  %1715 = vst.msk [vmem:[%s2923_s22 + $0xa8] sm:$0xf] %vm1672_vm1, %v2063_v39  ;;  %v2061_v22 = vpack.c.bf16 %v1392_v59, %v1392_v59  ;;  %v1395_v57 = vmul.f32 %v2374_v4, %v2865_v33  ;;  %2401 = vpow2.f32 %v3022_v29  ;;  %v3104_v48 = vadd.f32 %v2747_v36, %v886_v43  ;;  %v2183_v43 = vpop.f32.mrf.mxu1 }
 0x127   : > { %v2378_v31 = vpop.eup %2377  ;;  %1681 = vst.msk [vmem:[%s2923_s22 + $0x20] sm:$0xf] %vm1672_vm1, %v2029_v13  ;;  %v2032_v16 = vpack.c.bf16 %v1363_v1, %v1363_v1  ;;  %v1361_v62 = vmul.f32 %v2376_v2, %v2868_v40  ;;  %2403 = vpow2.f32 %v1907_v46  ;;  %v1911_v9 = vmul.f32 -1.442695, %v3085_v8 }
 0x128   : > { %v2380_v30 = vpop.eup %2379  ;;  %1713 = vst.msk [vmem:[%s2923_s22 + $0xa0] sm:$0xf] %vm1672_vm1, %v2061_v22  ;;  %v2064_v33 = vpack.c.bf16 %v1395_v57, %v1395_v57  ;;  %v1393_v29 = vmul.f32 %v2378_v31, %v2872_v47  ;;  %2405 = vpow2.f32 %v1939_v55  ;;  %v1943_v17 = vmul.f32 -1.442695, %v3092_v41 }
 0x129   : > { %v2382_v5 = vpop.eup %2381  ;;  %1684 = vst.msk [vmem:[%s2923_s22 + $0x2c] sm:$0xf] %vm1672_vm1, %v2032_v16  ;;  %v2030_v40 = vpack.c.bf16 %v1361_v62, %v1361_v62  ;;  %v1366_v46 = vmul.f32 %v2380_v30, %v2876_v53  ;;  %2407 = vpow2.f32 %v1905_v12  ;;  %v1909_v23 = vmul.f32 -1.442695, %v3098_v63  ;;  %v798_v62 = vpop.f32.mrf.mxu1 }
 0x12a   : > { %v2384_v50 = vpop.eup %2383  ;;  %1716 = vst.msk [vmem:[%s2923_s22 + $0xac] sm:$0xf] %vm1672_vm1, %v2064_v33  ;;  %v2062_v47 = vpack.c.bf16 %v1393_v29, %v1393_v29  ;;  %v1398_v55 = vmul.f32 %v2382_v5, %v2881_v61  ;;  %2409 = vpow2.f32 %v3056_v58  ;;  %v1941_v35 = vmul.f32 -1.442695, %v3104_v48 }
 0x12b   : > { %v2386_v32 = vpop.eup %2385  ;;  %1682 = vst.msk [vmem:[%s2923_s22 + $0x24] sm:$0xf] %vm1672_vm1, %v2030_v40  ;;  %v2035_v53 = vpack.c.bf16 %v1366_v46, %v1366_v46  ;;  %v1364_v12 = vmul.f32 %v2384_v50, %v2886_v7  ;;  %2411 = vpow2.f32 %v3059_v3  ;;  %v859_v59 = vmul.f32 %v2150_v45, %v2742_v34 }
 0x12c   : > { %v2388_v54 = vpop.eup %2387  ;;  %1714 = vst.msk [vmem:[%s2923_s22 + $0xa4] sm:$0xf] %vm1672_vm1, %v2062_v47  ;;  %v2067_v61 = vpack.c.bf16 %v1398_v55, %v1398_v55  ;;  %v1396_v58 = vmul.f32 %v2386_v32, %v2890_v15  ;;  %2413 = vpow2.f32 %v3062_v44  ;;  %v891_v13 = vmul.f32 %v2182_v51, %v2742_v34  ;;  %v670_v51 = vpop.f32.mrf.mxu0 }
 0x12d   : > { %v2390_v39 = vpop.eup %2389  ;;  %1687 = vst.msk [vmem:[%s2923_s22 + $0x38] sm:$0xf] %vm1672_vm1, %v2035_v53  ;;  %v2033_v7 = vpack.c.bf16 %v1364_v12, %v1364_v12  ;;  %v1367_v3 = vmul.f32 %v2388_v54, %v2930_v52  ;;  %2415 = vpow2.f32 %v3066_v42  ;;  %v857_v45 = vmul.f32 %v2742_v34, %v667_v14  ;;  %v2186_v53 = vpop.f32.mrf.mxu1 }
 0x12e   : > { %v2392_v4 = vpop.eup %2391  ;;  %1719 = vst.msk [vmem:[%s2923_s22 + $0xb8] sm:$0xf] %vm1672_vm1, %v2067_v61  ;;  %v2065_v15 = vpack.c.bf16 %v1396_v58, %v1396_v58  ;;  %v1399_v44 = vmul.f32 %v2390_v39, %v2937_v18  ;;  %2417 = vpow2.f32 %v3071_v21  ;;  %v889_v21 = vmul.f32 %v2742_v34, %v795_v11  ;;  %v2154_v50 = vpop.f32.mrf.mxu0  ;;  %v3177_v39 = vld [vmem:[%s3407_s2] ss:$0 sm:$0xff] }
 0x12f   : > { %v2394_v1 = vpop.eup %2393  ;;  %1685 = vst.msk [vmem:[%s2923_s22 + $0x30] sm:$0xf] %vm1672_vm1, %v2033_v7  ;;  %v2036_v52 = vpack.c.bf16 %v1367_v3, %v1367_v3  ;;  %v1365_v42 = vmul.f32 %v2392_v4, %v2943_v25  ;;  %2419 = vpow2.f32 %v1911_v9  ;;  %v3146_v16 = vadd.f32 %v2747_v36, %v859_v59 }
 0x130   : > { %v2396_v2 = vpop.eup %2395  ;;  %1717 = vst.msk [vmem:[%s2923_s22 + $0xb0] sm:$0xf] %vm1672_vm1, %v2065_v15  ;;  %v2068_v22 = vpack.c.bf16 %v1399_v44, %v1399_v44  ;;  %v1397_v18 = vmul.f32 %v2394_v1, %v2949_v37  ;;  %2421 = vpow2.f32 %v1943_v17  ;;  %v3151_v29 = vadd.f32 %v2747_v36, %v891_v13  ;;  %v3187_v44 = vld [vmem:[%s3408_s3] ss:$0 sm:$0xff] }
 0x131   : > { %v2398_v57 = vpop.eup %2397  ;;  %1688 = vst.msk [vmem:[%s2923_s22 + $0x3c] sm:$0xf] %vm1672_vm1, %v2036_v52  ;;  %v2034_v31 = vpack.c.bf16 %v1365_v42, %v1365_v42  ;;  %v1178_v25 = vadd.f32 1.0, %v2396_v2  ;;  %2423 = vpow2.f32 %v1909_v23  ;;  %v3156_v40 = vadd.f32 %v2747_v36, %v857_v45  ;;  %v811_v52 = vpop.f32.mrf.mxu1 }
 0x132   : > { %v2400_v30 = vpop.eup %2399  ;;  %1720 = vst.msk [vmem:[%s2923_s22 + $0xbc] sm:$0xf] %vm1672_vm1, %v2068_v22  ;;  %v2066_v37 = vpack.c.bf16 %v1397_v18, %v1397_v18  ;;  %v1210_v33 = vadd.f32 1.0, %v2398_v57  ;;  %2425 = vpow2.f32 %v1941_v35  ;;  %v3161_v11 = vadd.f32 %v2747_v36, %v889_v21 }
 0x133   : > { %v2402_v14 = vpop.eup %2401  ;;  %1686 = vst.msk [vmem:[%s2923_s22 + $0x34] sm:$0xf] %vm1672_vm1, %v2034_v31  ;;  %2427 = vrcp.f32 %v1178_v25  ;;  %v1176_v5 = vadd.f32 1.0, %v2400_v30  ;;  %v3164_v17 = vmul.f32 -1.442695, %v3146_v16  ;;  %v860_v32 = vmul.f32 %v2151_v60, %v2742_v34 }
 0x134   : > { %v2404_v46 = vpop.eup %2403  ;;  %1718 = vst.msk [vmem:[%s2923_s22 + $0xb4] sm:$0xf] %vm1672_vm1, %v2066_v37  ;;  %2429 = vrcp.f32 %v1210_v33  ;;  %v1208_v9 = vadd.f32 1.0, %v2402_v14  ;;  %v3168_v54 = vmul.f32 -1.442695, %v3151_v29  ;;  %v892_v61 = vmul.f32 %v2183_v43, %v2742_v34  ;;  %v683_v43 = vpop.f32.mrf.mxu0 }
 0x135   : > { %v2406_v47 = vpop.eup %2405  ;;  %2431 = vrcp.f32 %v1176_v5  ;;  %v1179_v55 = vadd.f32 1.0, %v2404_v46  ;;  %v3172_v35 = vmul.f32 -1.442695, %v3156_v40  ;;  %v858_v60 = vmul.f32 %v3177_v39, %v670_v51 }
 0x136   : > { %v2408_v12 = vpop.eup %2407  ;;  %2433 = vrcp.f32 %v1208_v9  ;;  %v1211_v23 = vadd.f32 1.0, %v2406_v47  ;;  %v3181_v59 = vmul.f32 -1.442695, %v3161_v11  ;;  %v890_v34 = vmul.f32 %v3177_v39, %v798_v62 }
 0x137   : > { %v2410_v36 = vpop.eup %2409  ;;  %2435 = vrcp.f32 %v1179_v55  ;;  %v1177_v58 = vadd.f32 1.0, %v2408_v12  ;;  %v3190_v13 = vadd.f32 %v3187_v44, %v860_v32  ;;  %v863_v1 = vmul.f32 %v3177_v39, %v2154_v50  ;;  %v2155_v55 = vpop.f32.mrf.mxu0 }
 0x138   : > { %v2412_v7 = vpop.eup %2411  ;;  %2437 = vrcp.f32 %v1211_v23  ;;  %v1209_v3 = vadd.f32 1.0, %v2410_v36  ;;  %v3194_v2 = vadd.f32 %v3187_v44, %v892_v61  ;;  %v895_v22 = vmul.f32 %v3177_v39, %v2186_v53  ;;  %v2187_v61 = vpop.f32.mrf.mxu1 }
 0x139   : > { %v2414_v4 = vpop.eup %2413  ;;  %2439 = vrcp.f32 %v1177_v58  ;;  %v1182_v15 = vadd.f32 1.0, %v2412_v7  ;;  %v3198_v51 = vadd.f32 %v3187_v44, %v858_v60  ;;  %v861_v57 = vmul.f32 %v3177_v39, %v683_v43 }
 0x13a   : > { %v2416_v42 = vpop.eup %2415  ;;  %2441 = vrcp.f32 %v1209_v3  ;;  %v1214_v45 = vadd.f32 1.0, %v2414_v4  ;;  %v3202_v62 = vadd.f32 %v3187_v44, %v890_v34  ;;  %v893_v30 = vmul.f32 %v3177_v39, %v811_v52 }
 0x13b   : > { %v2418_v18 = vpop.eup %2417  ;;  %2443 = vrcp.f32 %v1182_v15  ;;  %v1180_v21 = vadd.f32 1.0, %v2416_v42  ;;  %v3206_v14 = vadd.f32 %v3187_v44, %v863_v1  ;;  %v3209_v5 = vadd.f32 %v3187_v44, %v895_v22 }
 0x13c   : > { %v2420_v31 = vpop.eup %2419  ;;  %2445 = vrcp.f32 %v1214_v45  ;;  %v1212_v25 = vadd.f32 1.0, %v2418_v18  ;;  %v1915_v50 = vmul.f32 -1.442695, %v3190_v13  ;;  %v3213_v47 = vadd.f32 %v3187_v44, %v861_v57  ;;  %v686_v45 = vpop.f32.mrf.mxu0 }
 0x13d   : > { %v2422_v37 = vpop.eup %2421  ;;  %2447 = vrcp.f32 %v1180_v21  ;;  %v1183_v33 = vadd.f32 1.0, %v2420_v31  ;;  %v1947_v12 = vmul.f32 -1.442695, %v3194_v2  ;;  %v3217_v23 = vadd.f32 %v3187_v44, %v893_v30  ;;  %v814_v57 = vpop.f32.mrf.mxu1 }
 0x13e   : > { %v2424_v46 = vpop.eup %2423  ;;  %2449 = vrcp.f32 %v1212_v25  ;;  %v1215_v9 = vadd.f32 1.0, %v2422_v37  ;;  %v1913_v60 = vmul.f32 -1.442695, %v3198_v51  ;;  %v1945_v7 = vmul.f32 -1.442695, %v3202_v62 }
 0x13f   : > { %v2426_v32 = vpop.eup %2425  ;;  %2451 = vrcp.f32 %v1183_v33  ;;  %v1181_v53 = vadd.f32 1.0, %v2424_v46  ;;  %v1918_v43 = vmul.f32 -1.442695, %v3206_v14  ;;  %v3224_v4 = vmul.f32 -1.442695, %v3209_v5 }
 0x140   : > { %v2428_v36 = vpop.eup %2427  ;;  %2453 = vrcp.f32 %v1215_v9  ;;  %v1213_v58 = vadd.f32 1.0, %v2426_v32  ;;  %v3228_v52 = vmul.f32 -1.442695, %v3213_v47  ;;  %v864_v42 = vmul.f32 %v3177_v39, %v2155_v55 }
 0x141   : > { %v2430_v3 = vpop.eup %2429  ;;  %v1370_v34 = vmul.f32 %v2428_v36, %v2991_v26  ;;  %2455 = vrcp.f32 %v1181_v53  ;;  %v3234_v21 = vmul.f32 -1.442695, %v3217_v23  ;;  %v896_v30 = vmul.f32 %v3177_v39, %v2187_v61 }
 0x142   : > { %v2432_v15 = vpop.eup %2431  ;;  %v1402_v1 = vmul.f32 %v2430_v3, %v2996_v27  ;;  %2457 = vrcp.f32 %v1213_v58 }
 0x143   : > { %v2434_v22 = vpop.eup %2433  ;;  %v2039_v18 = vpack.c.bf16 %v1370_v34, %v1370_v34  ;;  %v1368_v26 = vmul.f32 %v2432_v15, %v3001_v0  ;;  %2459 = vpow2.f32 %v3164_v17  ;;  %v862_v17 = vmul.f32 %v3177_v39, %v686_v45 }
 0x144   : > { %v2436_v27 = vpop.eup %2435  ;;  %v2071_v31 = vpack.c.bf16 %v1402_v1, %v1402_v1  ;;  %v1400_v25 = vmul.f32 %v2434_v22, %v3004_v6  ;;  %2461 = vpow2.f32 %v3168_v54  ;;  %v894_v54 = vmul.f32 %v3177_v39, %v814_v57 }
 0x145   : > { %v2438_v37 = vpop.eup %2437  ;;  %1691 = vst.msk [vmem:[%s2923_s22 + $0x48] sm:$0xf] %vm1672_vm1, %v2039_v18  ;;  %v2037_v0 = vpack.c.bf16 %v1368_v26, %v1368_v26  ;;  %v1371_v33 = vmul.f32 %v2436_v27, %v3025_v10  ;;  %2463 = vpow2.f32 %v3172_v35  ;;  %v3253_v35 = vadd.f32 %v3187_v44, %v864_v42 }
 0x146   : > { %v2440_v46 = vpop.eup %2439  ;;  %1723 = vst.msk [vmem:[%s2923_s22 + $0xc8] sm:$0xf] %vm1672_vm1, %v2071_v31  ;;  %v2069_v6 = vpack.c.bf16 %v1400_v25, %v1400_v25  ;;  %v1403_v9 = vmul.f32 %v2438_v37, %v3028_v20  ;;  %2465 = vpow2.f32 %v3181_v59  ;;  %v3259_v39 = vadd.f32 %v3187_v44, %v896_v30 }
 0x147   : > { %v2442_v55 = vpop.eup %2441  ;;  %1689 = vst.msk [vmem:[%s2923_s22 + $0x40] sm:$0xf] %vm1672_vm1, %v2037_v0  ;;  %v2040_v10 = vpack.c.bf16 %v1371_v33, %v1371_v33  ;;  %v1369_v32 = vmul.f32 %v2440_v46, %v3031_v24  ;;  %2467 = vpow2.f32 %v1915_v50  ;;  %v3265_v36 = vadd.f32 %v3187_v44, %v862_v17 }
 0x148   : > { %v2444_v53 = vpop.eup %2443  ;;  %1721 = vst.msk [vmem:[%s2923_s22 + $0xc0] sm:$0xf] %vm1672_vm1, %v2069_v6  ;;  %v2072_v20 = vpack.c.bf16 %v1403_v9, %v1403_v9  ;;  %v1401_v61 = vmul.f32 %v2442_v55, %v3035_v28  ;;  %2469 = vpow2.f32 %v1947_v12  ;;  %v3271_v3 = vadd.f32 %v3187_v44, %v894_v54 }
 0x149   : > { %v2446_v59 = vpop.eup %2445  ;;  %1692 = vst.msk [vmem:[%s2923_s22 + $0x4c] sm:$0xf] %vm1672_vm1, %v2040_v10  ;;  %v2038_v24 = vpack.c.bf16 %v1369_v32, %v1369_v32  ;;  %v1374_v50 = vmul.f32 %v2444_v53, %v3039_v56  ;;  %2471 = vpow2.f32 %v1913_v60  ;;  %v1919_v15 = vmul.f32 -1.442695, %v3253_v35 }
 0x14a   : > { %v2448_v58 = vpop.eup %2447  ;;  %1724 = vst.msk [vmem:[%s2923_s22 + $0xcc] sm:$0xf] %vm1672_vm1, %v2072_v20  ;;  %v2070_v28 = vpack.c.bf16 %v1401_v61, %v1401_v61  ;;  %v1406_v12 = vmul.f32 %v2446_v59, %v3043_v38  ;;  %2473 = vpow2.f32 %v1945_v7  ;;  %v1951_v44 = vmul.f32 -1.442695, %v3259_v39 }
 0x14b   : > { %v2450_v34 = vpop.eup %2449  ;;  %1690 = vst.msk [vmem:[%s2923_s22 + $0x44] sm:$0xf] %vm1672_vm1, %v2038_v24  ;;  %v2043_v56 = vpack.c.bf16 %v1374_v50, %v1374_v50  ;;  %v1372_v60 = vmul.f32 %v2448_v58, %v3048_v49  ;;  %2475 = vpow2.f32 %v1918_v43  ;;  %v1917_v43 = vmul.f32 -1.442695, %v3265_v36 }
 0x14c   : > { %v2452_v1 = vpop.eup %2451  ;;  %1722 = vst.msk [vmem:[%s2923_s22 + $0xc4] sm:$0xf] %vm1672_vm1, %v2070_v28  ;;  %v2075_v42 = vpack.c.bf16 %v1406_v12, %v1406_v12  ;;  %v1404_v38 = vmul.f32 %v2450_v34, %v3052_v19  ;;  %2477 = vpow2.f32 %v3224_v4  ;;  %v1949_v18 = vmul.f32 -1.442695, %v3271_v3 }
 0x14d   : > { %v2454_v7 = vpop.eup %2453  ;;  %1695 = vst.msk [vmem:[%s2923_s22 + $0x58] sm:$0xf] %vm1672_vm1, %v2043_v56  ;;  %v2041_v45 = vpack.c.bf16 %v1372_v60, %v1372_v60  ;;  %v1375_v49 = vmul.f32 %v2452_v1, %v3085_v8  ;;  %2479 = vpow2.f32 %v3228_v52 }
 0x14e   : > { %v2456_v22 = vpop.eup %2455  ;;  %1727 = vst.msk [vmem:[%s2923_s22 + $0xd8] sm:$0xf] %vm1672_vm1, %v2075_v42  ;;  %v2073_v19 = vpack.c.bf16 %v1404_v38, %v1404_v38  ;;  %v1407_v4 = vmul.f32 %v2454_v7, %v3092_v41  ;;  %2481 = vpow2.f32 %v3234_v21 }
 0x14f   : > { %v2458_v26 = vpop.eup %2457  ;;  %1693 = vst.msk [vmem:[%s2923_s22 + $0x50] sm:$0xf] %vm1672_vm1, %v2041_v45  ;;  %v2044_v8 = vpack.c.bf16 %v1375_v49, %v1375_v49  ;;  %v1373_v52 = vmul.f32 %v2456_v22, %v3098_v63  ;;  %2483 = vpow2.f32 %v1919_v15 }
 0x150   : > { %v2460_v57 = vpop.eup %2459  ;;  %1725 = vst.msk [vmem:[%s2923_s22 + $0xd0] sm:$0xf] %vm1672_vm1, %v2073_v19  ;;  %v2076_v27 = vpack.c.bf16 %v1407_v4, %v1407_v4  ;;  %v1405_v31 = vmul.f32 %v2458_v26, %v3104_v48  ;;  %2485 = vpow2.f32 %v1951_v44 }
 0x151   : > { %v2462_v41 = vpop.eup %2461  ;;  %1696 = vst.msk [vmem:[%s2923_s22 + $0x5c] sm:$0xf] %vm1672_vm1, %v2044_v8  ;;  %v2042_v21 = vpack.c.bf16 %v1373_v52, %v1373_v52  ;;  %v1186_v25 = vadd.f32 1.0, %v2460_v57  ;;  %2487 = vpow2.f32 %v1917_v43 }
 0x152   : > { %v2464_v30 = vpop.eup %2463  ;;  %1728 = vst.msk [vmem:[%s2923_s22 + $0xdc] sm:$0xf] %vm1672_vm1, %v2076_v27  ;;  %v2074_v63 = vpack.c.bf16 %v1405_v31, %v1405_v31  ;;  %v1218_v37 = vadd.f32 1.0, %v2462_v41  ;;  %2489 = vpow2.f32 %v1949_v18 }
 0x153   : > { %v2466_v0 = vpop.eup %2465  ;;  %1694 = vst.msk [vmem:[%s2923_s22 + $0x54] sm:$0xf] %vm1672_vm1, %v2042_v21  ;;  %2491 = vrcp.f32 %v1186_v25  ;;  %v1184_v33 = vadd.f32 1.0, %v2464_v30 }
 0x154   : > { %v2468_v48 = vpop.eup %2467  ;;  %1726 = vst.msk [vmem:[%s2923_s22 + $0xd4] sm:$0xf] %vm1672_vm1, %v2074_v63  ;;  %2493 = vrcp.f32 %v1218_v37  ;;  %v1216_v17 = vadd.f32 1.0, %v2466_v0 }
 0x155   : > { %v2470_v46 = vpop.eup %2469  ;;  %2495 = vrcp.f32 %v1184_v33  ;;  %v1187_v6 = vadd.f32 1.0, %v2468_v48 }
 0x156   : > { %v2472_v9 = vpop.eup %2471  ;;  %2497 = vrcp.f32 %v1216_v17  ;;  %v1219_v54 = vadd.f32 1.0, %v2470_v46 }
 0x157   : > { %v2474_v55 = vpop.eup %2473  ;;  %2499 = vrcp.f32 %v1187_v6  ;;  %v1185_v10 = vadd.f32 1.0, %v2472_v9 }
 0x158   : > { %v2476_v32 = vpop.eup %2475  ;;  %2501 = vrcp.f32 %v1219_v54  ;;  %v1217_v53 = vadd.f32 1.0, %v2474_v55 }
 0x159   : > { %v2478_v20 = vpop.eup %2477  ;;  %2503 = vrcp.f32 %v1185_v10  ;;  %v1190_v61 = vadd.f32 1.0, %v2476_v32 }
 0x15a   : > { %v2480_v59 = vpop.eup %2479  ;;  %2505 = vrcp.f32 %v1217_v53  ;;  %v1222_v24 = vadd.f32 1.0, %v2478_v20 }
 0x15b   : > { %v2482_v50 = vpop.eup %2481  ;;  %2507 = vrcp.f32 %v1190_v61  ;;  %v1188_v58 = vadd.f32 1.0, %v2480_v59 }
 0x15c   : > { %v2484_v28 = vpop.eup %2483  ;;  %2509 = vrcp.f32 %v1222_v24  ;;  %v1220_v12 = vadd.f32 1.0, %v2482_v50 }
 0x15d   : > { %v2486_v34 = vpop.eup %2485  ;;  %2511 = vrcp.f32 %v1188_v58  ;;  %v1191_v56 = vadd.f32 1.0, %v2484_v28 }
 0x15e   : > { %v2488_v60 = vpop.eup %2487  ;;  %2513 = vrcp.f32 %v1220_v12  ;;  %v1223_v15 = vadd.f32 1.0, %v2486_v34 }
 0x15f   : > { %v2490_v1 = vpop.eup %2489  ;;  %2515 = vrcp.f32 %v1191_v56  ;;  %v1189_v42 = vadd.f32 1.0, %v2488_v60 }
 0x160   : > { %v2492_v38 = vpop.eup %2491  ;;  %2517 = vrcp.f32 %v1223_v15  ;;  %v1221_v44 = vadd.f32 1.0, %v2490_v1 }
 0x161   : > { %v2494_v7 = vpop.eup %2493  ;;  %v1378_v45 = vmul.f32 %v2492_v38, %v3146_v16  ;;  %2519 = vrcp.f32 %v1189_v42 }
 0x162   : > { %v2496_v49 = vpop.eup %2495  ;;  %v1410_v43 = vmul.f32 %v2494_v7, %v3151_v29  ;;  %2521 = vrcp.f32 %v1221_v44 }
 0x163   : > { %v2498_v22 = vpop.eup %2497  ;;  %v2047_v19 = vpack.c.bf16 %v1378_v45, %v1378_v45  ;;  %v1376_v4 = vmul.f32 %v2496_v49, %v3156_v40 }
 0x164   : > { %v2500_v18 = vpop.eup %2499  ;;  %v2079_v26 = vpack.c.bf16 %v1410_v43, %v1410_v43  ;;  %v1408_v8 = vmul.f32 %v2498_v22, %v3161_v11 }
 0x165   : > { %v2502_v52 = vpop.eup %2501  ;;  %1699 = vst.msk [vmem:[%s2923_s22 + $0x68] sm:$0xf] %vm1672_vm1, %v2047_v19  ;;  %v2045_v16 = vpack.c.bf16 %v1376_v4, %v1376_v4  ;;  %v1379_v57 = vmul.f32 %v2500_v18, %v3190_v13 }
 0x166   : > { %v2504_v27 = vpop.eup %2503  ;;  %1731 = vst.msk [vmem:[%s2923_s22 + $0xe8] sm:$0xf] %vm1672_vm1, %v2079_v26  ;;  %v2077_v29 = vpack.c.bf16 %v1408_v8, %v1408_v8  ;;  %v1411_v31 = vmul.f32 %v2502_v52, %v3194_v2 }
 0x167   : > { %v2506_v40 = vpop.eup %2505  ;;  %1697 = vst.msk [vmem:[%s2923_s22 + $0x60] sm:$0xf] %vm1672_vm1, %v2045_v16  ;;  %v2048_v41 = vpack.c.bf16 %v1379_v57, %v1379_v57  ;;  %v1377_v11 = vmul.f32 %v2504_v27, %v3198_v51 }
 0x168   : > { %v2508_v21 = vpop.eup %2507  ;;  %1729 = vst.msk [vmem:[%s2923_s22 + $0xe0] sm:$0xf] %vm1672_vm1, %v2077_v29  ;;  %v2080_v25 = vpack.c.bf16 %v1411_v31, %v1411_v31  ;;  %v1409_v13 = vmul.f32 %v2506_v40, %v3202_v62 }
 0x169   : > { %v2510_v30 = vpop.eup %2509  ;;  %1700 = vst.msk [vmem:[%s2923_s22 + $0x6c] sm:$0xf] %vm1672_vm1, %v2048_v41  ;;  %v2046_v63 = vpack.c.bf16 %v1377_v11, %v1377_v11  ;;  %v1382_v2 = vmul.f32 %v2508_v21, %v3206_v14 }
 0x16a   : > { %v2512_v37 = vpop.eup %2511  ;;  %1732 = vst.msk [vmem:[%s2923_s22 + $0xec] sm:$0xf] %vm1672_vm1, %v2080_v25  ;;  %v2078_v0 = vpack.c.bf16 %v1409_v13, %v1409_v13  ;;  %v1414_v51 = vmul.f32 %v2510_v30, %v3209_v5 }
 0x16b   : > { %v2514_v33 = vpop.eup %2513  ;;  %1698 = vst.msk [vmem:[%s2923_s22 + $0x64] sm:$0xf] %vm1672_vm1, %v2046_v63  ;;  %v2051_v62 = vpack.c.bf16 %v1382_v2, %v1382_v2  ;;  %v1380_v48 = vmul.f32 %v2512_v37, %v3213_v47 }
 0x16c   : > { %v2516_v17 = vpop.eup %2515  ;;  %1730 = vst.msk [vmem:[%s2923_s22 + $0xe4] sm:$0xf] %vm1672_vm1, %v2078_v0  ;;  %v2083_v14 = vpack.c.bf16 %v1414_v51, %v1414_v51  ;;  %v1412_v46 = vmul.f32 %v2514_v33, %v3217_v23 }
 0x16d   : > { %v2518_v6 = vpop.eup %2517  ;;  %1703 = vst.msk [vmem:[%s2923_s22 + $0x78] sm:$0xf] %vm1672_vm1, %v2051_v62  ;;  %v2049_v5 = vpack.c.bf16 %v1380_v48, %v1380_v48  ;;  %v1383_v9 = vmul.f32 %v2516_v17, %v3253_v35 }
 0x16e   : > { %v2520_v54 = vpop.eup %2519  ;;  %1735 = vst.msk [vmem:[%s2923_s22 + $0xf8] sm:$0xf] %vm1672_vm1, %v2083_v14  ;;  %v2081_v47 = vpack.c.bf16 %v1412_v46, %v1412_v46  ;;  %v1415_v55 = vmul.f32 %v2518_v6, %v3259_v39 }
 0x16f   : > { %v2522_v23 = vpop.eup %2521  ;;  %1701 = vst.msk [vmem:[%s2923_s22 + $0x70] sm:$0xf] %vm1672_vm1, %v2049_v5  ;;  %v2052_v10 = vpack.c.bf16 %v1383_v9, %v1383_v9  ;;  %v1381_v32 = vmul.f32 %v2520_v54, %v3265_v36 }
 0x170   : > { %1733 = vst.msk [vmem:[%s2923_s22 + $0xf0] sm:$0xf] %vm1672_vm1, %v2081_v47  ;;  %v2084_v35 = vpack.c.bf16 %v1415_v55, %v1415_v55  ;;  %v1413_v53 = vmul.f32 %v2522_v23, %v3271_v3 }
 0x171   : > { %1704 = vst.msk [vmem:[%s2923_s22 + $0x7c] sm:$0xf] %vm1672_vm1, %v2052_v10  ;;  %v2050_v39 = vpack.c.bf16 %v1381_v32, %v1381_v32 }
 0x172   : > { %1736 = vst.msk [vmem:[%s2923_s22 + $0xfc] sm:$0xf] %vm1672_vm1, %v2084_v35  ;;  %v2082_v36 = vpack.c.bf16 %v1413_v53, %v1413_v53 }
 0x173   : > { %1702 = vst.msk [vmem:[%s2923_s22 + $0x74] sm:$0xf] %vm1672_vm1, %v2050_v39 }
 0x174   : > { %1734 = vst.msk [vmem:[%s2923_s22 + $0xf4] sm:$0xf] %vm1672_vm1, %v2082_v36 }
 0x175   : > { %2538 = shalt.err (!%p2535_p3)
}
 0x176   : > { %s2539_s13 = scalar_lea.hbm %s3353_s7, 4096  ;;  %s2543_s22 = scalar_lea.hbm %s3409_s4, 16384 }
 0x177   : > { %p2540_p4 = scmp.ne.s32.totalorder %s3353_s7, %s2539_s13  ;;  %p2544_p9 = scmp.lt.s32.totalorder %s3353_s7, %s3409_s4 }
 0x178   : > { %p2545_p10 = scmp.lt.s32.totalorder %s2543_s22, %s2539_s13 }
 0x179   : > { %p2541_p7 = pnand %p2540_p4, %p2653_p5 }
 0x17a   : > { %p2546_p11 = por %p2545_p10, %p2544_p9 }
 0x17b   : > { %p2542_p8 = pneg %p2541_p7 }
 0x17d   : > { %p2547_p12 = pnand %p2546_p11, %p2542_p8 }
 0x17f   : > { %2550 = shalt.err (!%p2547_p12)
}
 0x180   : > { %s2588_s28 = smov 64   ;;  %s2589_s29 = smov 4  }
 0x181   : > { %2192 = dma.vmem_to_hbm [thread:$0]  (%p2653_p5), %s3355_s5, 4096, %s3353_s7, %s3365_s8, %s2588_s28, %s2588_s28, %s2589_s29  }
 0x182 PF: > { %p2198_p13 = scmp.ge.s32.totalorder %s2585_s18, 2  ;;  %s1766_s30 = sand.u32 1, %s2573_s15  }
 0x183   : > { %s1767_s6 = scalar_lea.sflag [#allocation3], %s1766_s30 }
 0x184   : > { %p2195_p0 = pnand %p2198_p13, %p2657_p6 }
 0x186   : > { %p2196_p1 = pneg %p2195_p0 }
 0x188   : > { %2568 = dma.done.wait (%p2196_p1), %s1767_s6, 4096  }
 0x189   : > { %2570 = vsyncadd (%p2196_p1), %s1767_s6, 4294963200  ;;  %p14_p2 = scmp.ge.s32.totalorder %s2640_s21, 6   ;;  %s3412_s15 = smov %s2577_s16 }
 0x18a   : > { %s3413_s16 = smov %s2581_s17  ;;  %s3414_s17 = smov %s2651_s24 }
 0x18b   : > { %s3415_s18 = smov %s2640_s21  ;;  %16 = sbr.rel (!%p14_p2) target bundleno = 3 (0x3), region = 71 }
 0x190   :  { %1772 = vsyncpa [#allocation3], 1 }
 0x191   :  { %1774 = vsyncpa [#allocation3 + $0x1], 1 }

</bundles_post_ra>
